<compile_context>
chip_gen: v7x
topology: tpu7x:2x2x1
jax: 0.10.0
libtpu: 0.0.40
codegen_flags: <defaults>
</compile_context>

<pallas_src>
import functools

import numpy as np
import jax
import jax.numpy as jnp
from jax.experimental import pallas as pl
from jax.experimental.pallas import tpu as pltpu

# ---- constants from the PyTorch module --------------------------------------
MEL_MAX_HZ = 7500.0
MEL_MIN_HZ = 125.0
NUM_FRAMES = 96
NUM_MEL_BINS = 64
SAMPLE_RATE = 16000
STFT_HOP_LENGTH_SECONDS = 0.01
STFT_WINDOW_LENGTH_SECONDS = 0.025

HOP_LENGTH = int(np.round(STFT_HOP_LENGTH_SECONDS * SAMPLE_RATE))      # 160
WIN_LENGTH = int(np.round(STFT_WINDOW_LENGTH_SECONDS * SAMPLE_RATE))   # 400
N_FFT = 2 ** int(np.ceil(np.log(WIN_LENGTH) / np.log(2.0)))            # 512
N_FREQS = N_FFT // 2 + 1                                               # 257
# Mel filters are exactly zero for bins >= 240 (7500 Hz); keeping 256 bins
# (2*128 lanes) is both lane-aligned and numerically exact.
N_FREQS_PAD = 256
N_MEL_PAD = 128                                                        # lane-dense output width

MEAN = -5.8703
STD = 0.0043
INV_STD = 1.0 / STD   # multiply instead of divide in-kernel (one extra rounding of 1/STD)
EPS = 1e-10


# ---- deterministic parameter construction (torchaudio-equivalent) -----------
def _hann_window_padded():
    # torch.hann_window(WIN_LENGTH) (periodic=True), centered zero-pad to N_FFT,
    # as torch.stft does when win_length < n_fft.
    n = np.arange(WIN_LENGTH, dtype=np.float64)
    w = 0.5 * (1.0 - np.cos(2.0 * np.pi * n / WIN_LENGTH))
    pad_left = (N_FFT - WIN_LENGTH) // 2
    pad_right = N_FFT - WIN_LENGTH - pad_left
    return np.pad(w, (pad_left, pad_right))


@functools.lru_cache(maxsize=1)
def _dft_weight():
    """Fused [N_FFT, 2*N_FREQS_PAD] real-DFT weight: cols [0,256)=windowed cos,
    cols [256,512)=windowed -sin, for frequency bins 0..255.  Bins >= 240 carry
    zero mel weight, so dropping bin 256 (and the old 257..383 pad) is exact."""
    w = _hann_window_padded()                                   # [N_FFT]
    n = np.arange(N_FFT, dtype=np.float64)[:, None]             # [N_FFT, 1]
    k = np.arange(N_FREQS_PAD, dtype=np.float64)[None, :]       # [1, 256]
    ang = 2.0 * np.pi * n * k / N_FFT
    cos_m = w[:, None] * np.cos(ang)                            # [N_FFT, 256]
    sin_m = -w[:, None] * np.sin(ang)                           # [N_FFT, 256]
    return np.concatenate([cos_m, sin_m], axis=1).astype(np.float32)   # [512, 512]


@functools.lru_cache(maxsize=1)
def _melscale_fbanks_padded():
    """torchaudio.functional.melscale_fbanks (mel_scale='htk', norm=None),
    truncated to the first N_FREQS_PAD=256 frequency bins (all nonzero filter
    weights live below bin 240 = 7500 Hz) and zero-padded to 128 mel columns
    so the kernel's output block is lane-dense."""
    all_freqs = np.linspace(0.0, SAMPLE_RATE // 2, N_FREQS)
    hz_to_mel = lambda f: 2595.0 * np.log10(1.0 + f / 700.0)
    mel_to_hz = lambda m: 700.0 * (10.0 ** (m / 2595.0) - 1.0)
    m_min, m_max = hz_to_mel(MEL_MIN_HZ), hz_to_mel(MEL_MAX_HZ)
    m_pts = np.linspace(m_min, m_max, NUM_MEL_BINS + 2)
    f_pts = mel_to_hz(m_pts)
    f_diff = f_pts[1:] - f_pts[:-1]                             # [n_mels+1]
    slopes = f_pts[None, :] - all_freqs[:, None]                # [N_FREQS, n_mels+2]
    down = -slopes[:, :-2] / f_diff[:-1]
    up = slopes[:, 2:] / f_diff[1:]
    fb = np.maximum(0.0, np.minimum(down, up))                  # [N_FREQS, NUM_MEL_BINS]
    fb_pad = np.zeros((N_FREQS_PAD, N_MEL_PAD), dtype=np.float32)
    fb_pad[:, :NUM_MEL_BINS] = fb[:N_FREQS_PAD].astype(np.float32)
    return fb_pad


# ---- Pallas kernel: fused DFT -> power -> mel -> log -> normalize ------------
def _vggish_preproc_kernel(frames_ref, w_ref, fb_ref, out_ref):
    x = frames_ref[...]                                                  # [TM, 512]
    # single MXU matmul producing [re | im] in one [TM, 512] slab
    y = jnp.dot(x, w_ref[...], preferred_element_type=jnp.float32)      # [TM, 512]
    re = y[:, :N_FREQS_PAD]                                              # lane-aligned slice (256)
    im = y[:, N_FREQS_PAD:]
    power = re * re + im * im                                            # power=2 spectrogram
    mel = jnp.dot(power, fb_ref[...], preferred_element_type=jnp.float32) + EPS
    # NOTE: padded mel columns [64:128) hold log(1e-10)-derived garbage and are
    # sliced off in the wrapper; never consume them directly.
    out_ref[...] = (jnp.log(mel) - MEAN) * INV_STD                       # log on EUP, mul on VALU


def _pick_tm(m: int) -> int:
    """Largest multiple-of-8 divisor of m (capped at 512).  Prefer an even
    number of grid steps (balances v7x's two TensorCores), then >=2 steps,
    then a single full step.  Returns 0 if no multiple-of-8 divisor exists
    (caller falls back to padded 128-row tiles)."""
    divs = [d for d in range(8, min(m, 512) + 1, 8) if m % d == 0]
    if not divs:
        return 0
    even = [d for d in divs if (m // d) >= 2 and (m // d) % 2 == 0]
    if even:
        return max(even)
    multi = [d for d in divs if (m // d) >= 2]
    if multi:
        return max(multi)
    return max(divs)


@jax.jit
def vggish_preproc(waveform: jnp.ndarray) -> jnp.ndarray:
    """waveform: [B, T] float32 at 16 kHz -> [B, 1, NUM_FRAMES, NUM_MEL_BINS]."""
    B, T = waveform.shape
    # The static gather below silently clamps out-of-bounds indices in JAX, so
    # enforce that enough samples exist for NUM_FRAMES centered frames.
    min_t = (NUM_FRAMES - 1) * HOP_LENGTH                               # 15200
    assert T >= min_t, f"waveform too short: T={T} < {min_t} (need {NUM_FRAMES} frames at 16 kHz)"

    # --- glue: center (reflect) pad + frame extraction, as torch.stft(center=True);
    #     only the first NUM_FRAMES frames are needed (torch slices [:, :NUM_FRAMES]).
    pad = N_FFT // 2
    padded = jnp.pad(waveform.astype(jnp.float32), ((0, 0), (pad, pad)), mode="reflect")
    starts = jnp.arange(NUM_FRAMES) * HOP_LENGTH
    idx = starts[:, None] + jnp.arange(N_FFT)[None, :]                  # [NUM_FRAMES, N_FFT]
    frames = padded[:, idx].reshape(B * NUM_FRAMES, N_FFT)              # [B*96, 512]

    M = B * NUM_FRAMES
    TM = _pick_tm(M)
    if TM == 0:                                                         # unreachable for M = 96*B
        TM = 128
        M_pad = pl.cdiv(M, TM) * TM
        frames = jnp.pad(frames, ((0, M_pad - M), (0, 0)))
    else:
        M_pad = M                                                       # no row padding

    # constants become jit-time constants (built once on host via lru_cache)
    w_fused = jnp.asarray(_dft_weight())                                # [512, 512]
    fb = jnp.asarray(_melscale_fbanks_padded())                         # [256, 128]

    grid = (M_pad // TM,)
    cost = pl.CostEstimate(
        flops=int(2 * M_pad * N_FFT * (2 * N_FREQS_PAD)
                  + 2 * M_pad * N_FREQS_PAD * N_MEL_PAD
                  + 3 * M_pad * N_FREQS_PAD),
        transcendentals=int(M_pad * N_MEL_PAD),
        bytes_accessed=int(4 * (M_pad * N_FFT
                                + N_FFT * 2 * N_FREQS_PAD
                                + N_FREQS_PAD * N_MEL_PAD
                                + M_pad * N_MEL_PAD)),
    )

    out = pl.pallas_call(
        _vggish_preproc_kernel,
        out_shape=jax.ShapeDtypeStruct((M_pad, N_MEL_PAD), jnp.float32),
        grid=grid,
        in_specs=[
            pl.BlockSpec((TM, N_FFT), lambda i: (i, 0)),
            pl.BlockSpec((N_FFT, 2 * N_FREQS_PAD), lambda i: (0, 0)),
            pl.BlockSpec((N_FREQS_PAD, N_MEL_PAD), lambda i: (0, 0)),
        ],
        out_specs=pl.BlockSpec((TM, N_MEL_PAD), lambda i: (i, 0)),
        compiler_params=pltpu.CompilerParams(dimension_semantics=("parallel",)),
        cost_estimate=cost,
    )(frames, w_fused, fb)

    # strip (possible) row padding and the zero mel columns; -> NCHW [B, 1, 96, 64]
    logmel = out[:M, :NUM_MEL_BINS].reshape(B, NUM_FRAMES, NUM_MEL_BINS)
    return logmel[:, None, :, :]


if __name__ == "__main__":
    # 0.96 s of audio at 16 kHz per example -> 96 frames (first 96, as in torch).
    # TODO(synk): resampling branch (sr != 16000) of the torch module is not
    # implemented; inputs are assumed to already be at SAMPLE_RATE.
    B, T = 2, 15360
    key = jax.random.PRNGKey(0)
    waveform = jax.random.uniform(key, (B, T), dtype=jnp.float32, minval=-1.0, maxval=1.0)

    logmel = vggish_preproc(waveform)
    jax.block_until_ready(logmel)
    assert logmel.shape == (B, 1, NUM_FRAMES, NUM_MEL_BINS)
    assert logmel.dtype == jnp.float32
    print("KERNEL_OK")
</pallas_src>

<mosaic_0001>
module attributes {stable_mosaic.version = 11 : i64} {
  func.func @_vggish_preproc_kernel(%arg0: i32, %arg1: memref<96x512xf32, #tpu.memory_space<vmem>>, %arg2: memref<512x512xf32, #tpu.memory_space<vmem>>, %arg3: memref<256x128xf32, #tpu.memory_space<vmem>>, %arg4: memref<96x128xf32, #tpu.memory_space<vmem>>) attributes {dimension_semantics = [#tpu.dimension_semantics<parallel>], iteration_bounds = array<i64: 2>, scalar_prefetch = 0 : i64, scratch_operands = 0 : i64, tpu.core_type = #tpu.core_type<tc>, window_params = [{transform_indices = @transform_0, window_bounds = array<i64: 96, 512>}, {pipeline_mode = #tpu.pipeline_mode<synchronous>, transform_indices = @transform_1, window_bounds = array<i64: 512, 512>}, {pipeline_mode = #tpu.pipeline_mode<synchronous>, transform_indices = @transform_2, window_bounds = array<i64: 256, 128>}, {transform_indices = @transform_3, window_bounds = array<i64: 96, 128>}]} {
    %c0 = arith.constant 0 : index
    %c0_0 = arith.constant 0 : index
    %0 = vector.load %arg1[%c0, %c0_0] : memref<96x512xf32, #tpu.memory_space<vmem>>, vector<96x512xf32>
    %c0_1 = arith.constant 0 : index
    %c0_2 = arith.constant 0 : index
    %1 = vector.load %arg2[%c0_1, %c0_2] : memref<512x512xf32, #tpu.memory_space<vmem>>, vector<512x512xf32>
    %cst = arith.constant dense<0.000000e+00> : vector<96x512xf32>
    %2 = tpu.matmul %0, %1, %cst {dimension_numbers = #tpu.dot_dimension_numbers<[1], [0], [0], [1], [0, 0, 1, 1], [], []>} : vector<96x512xf32>, vector<512x512xf32>, vector<96x512xf32> -> vector<96x512xf32>
    %3 = vector.extract_strided_slice %2 {offsets = [0, 0], sizes = [96, 256], strides = [1, 1]} : vector<96x512xf32> to vector<96x256xf32>
    %4 = vector.extract_strided_slice %2 {offsets = [0, 256], sizes = [96, 256], strides = [1, 1]} : vector<96x512xf32> to vector<96x256xf32>
    %5 = arith.mulf %3, %3 : vector<96x256xf32>
    %6 = arith.mulf %4, %4 : vector<96x256xf32>
    %7 = arith.addf %5, %6 : vector<96x256xf32>
    %c0_3 = arith.constant 0 : index
    %c0_4 = arith.constant 0 : index
    %8 = vector.load %arg3[%c0_3, %c0_4] : memref<256x128xf32, #tpu.memory_space<vmem>>, vector<256x128xf32>
    %cst_5 = arith.constant dense<0.000000e+00> : vector<96x128xf32>
    %9 = tpu.matmul %7, %8, %cst_5 {dimension_numbers = #tpu.dot_dimension_numbers<[1], [0], [0], [1], [0, 0, 1, 1], [], []>} : vector<96x256xf32>, vector<256x128xf32>, vector<96x128xf32> -> vector<96x128xf32>
    %cst_6 = arith.constant 1.000000e-10 : f32
    %10 = vector.broadcast %cst_6 : f32 to vector<96x128xf32>
    %11 = arith.addf %9, %10 : vector<96x128xf32>
    %12 = math.log %11 : vector<96x128xf32>
    %cst_7 = arith.constant -5.870300e+00 : f32
    %13 = vector.broadcast %cst_7 : f32 to vector<96x128xf32>
    %14 = arith.subf %12, %13 : vector<96x128xf32>
    %cst_8 = arith.constant 232.558136 : f32
    %15 = vector.broadcast %cst_8 : f32 to vector<96x128xf32>
    %16 = arith.mulf %14, %15 : vector<96x128xf32>
    %c0_9 = arith.constant 0 : index
    %c0_10 = arith.constant 0 : index
    %17 = vector.load %arg4[%c0_9, %c0_10] : memref<96x128xf32, #tpu.memory_space<vmem>>, vector<96x128xf32>
    tpu.vector_store %arg4[%c0_9, %c0_10], %16 {strides = array<i32>} : memref<96x128xf32, #tpu.memory_space<vmem>>, vector<96x128xf32>,
    return
  }
  func.func @transform_0(%arg0: i32) -> (i32, i32) {
    %c0_i32 = arith.constant 0 : i32
    %c0_i32_0 = arith.constant 0 : i32
    return %arg0, %c0_i32 : i32, i32
  }
  func.func @transform_1(%arg0: i32) -> (i32, i32) {
    %c0_i32 = arith.constant 0 : i32
    %c0_i32_0 = arith.constant 0 : i32
    %c0_i32_1 = arith.constant 0 : i32
    return %c0_i32, %c0_i32_0 : i32, i32
  }
  func.func @transform_2(%arg0: i32) -> (i32, i32) {
    %c0_i32 = arith.constant 0 : i32
    %c0_i32_0 = arith.constant 0 : i32
    %c0_i32_1 = arith.constant 0 : i32
    return %c0_i32, %c0_i32_0 : i32, i32
  }
  func.func @transform_3(%arg0: i32) -> (i32, i32) {
    %c0_i32 = arith.constant 0 : i32
    %c0_i32_0 = arith.constant 0 : i32
    return %arg0, %c0_i32 : i32, i32
  }
}

</mosaic_0001>

<bundles_post_ra>
// kernel: vggish_preproc.1
= control target key start
LH: loop header
LB: loop body
LE: loop exit
PB: predicated region body
PF: predicated region fallthrough
CT: control target
= control target key end

     0   :  { %s1877_s12 = smov 0   ;;  %s2834_s0 = inlined_call_operand.vmem [shape: f32[192,512], index: 0, kind: input, shape index: {}]   ;;  %s2835_s1 = inlined_call_operand.vmem [shape: f32[512,512], index: 1, kind: input, shape index: {}]   ;;  %s2836_s2 = inlined_call_operand.vmem [shape: f32[256,128], index: 2, kind: input, shape index: {}]   ;;  %s2837_s3 = inlined_call_operand.vmem [shape: f32[192,128], index: 3, kind: output, shape index: {}]  }
   0x1 LB: > { %s1374_s13 = sadd.s32 4294967295, %s1855_s12   ;;  %p1378_p0 = scmp.ge.s32.totalorder %s1855_s12, 1  ;;  %s1855_s12 = sphi %s1877_s12, %s13_s12  }
   0x2   : > { %p139_p1 = scmp.lt.s32.totalorder %s1855_s12, 3 }
   0x4   : > { %p140_p2 = pnand %p1378_p0, %p139_p1 }
   0x5   : > { %v226_v0 = vld [vmem:[%s2835_s1 + $0x8] sm:$0xff] (!%p140_p2)  ;;  %v228_v2 = vld [vmem:[%s2835_s1 + $0x18] sm:$0xff] (!%p140_p2)  ;;  %v225_v5 = vld [vmem:[%s2835_s1] sm:$0xff] (!%p140_p2)  ;;  %s2067_s7 = smul.u32 (!%p140_p2), 12, %s1374_s13 }
   0x6   : > { %143 = sbr.rel (%p140_p2) target bundleno = 635 (0x27b), region = 32  ;;  %v230_v1 = vld [vmem:[%s2835_s1 + $0x28] sm:$0xff] (!%p140_p2)  ;;  %v232_v4 = vld [vmem:[%s2835_s1 + $0x38] sm:$0xff] (!%p140_p2)  ;;  %v229_v6 = vld [vmem:[%s2835_s1 + $0x20] sm:$0xff] (!%p140_p2) }
   0x7   : > { %v1465_v3 = vpack.c.bf16 (!%p140_p2), %v230_v1, %v226_v0  ;;  %v1593_v7 = vpack.c.bf16 (!%p140_p2), %v232_v4, %v228_v2  ;;  %v1467_v8 = vpack.c.bf16 (!%p140_p2), %v229_v6, %v225_v5  ;;  %v227_v9 = vld [vmem:[%s2835_s1 + $0x10] sm:$0xff] (!%p140_p2)  ;;  %v234_v11 = vld [vmem:[%s2835_s1 + $0x48] sm:$0xff] (!%p140_p2)  ;;  %v236_v14 = vld [vmem:[%s2835_s1 + $0x58] sm:$0xff] (!%p140_p2)  ;;  %p165_p3 = scmp.lt.s32.totalorder (!%p140_p2), %s2067_s7, 23 }
   0x8   : > { %v231_v10 = vld [vmem:[%s2835_s1 + $0x30] sm:$0xff] (!%p140_p2)  ;;  %v238_v13 = vld [vmem:[%s2835_s1 + $0x68] sm:$0xff] (!%p140_p2)  ;;  %v240_v15 = vld [vmem:[%s2835_s1 + $0x78] sm:$0xff] (!%p140_p2) }
   0x9   : > { %1466 = vmatprep.subr.bf16.mxu0 (!%p140_p2), %v1465_v3  ;;  %v1595_v12 = vpack.c.bf16 (!%p140_p2), %v231_v10, %v227_v9  ;;  %1594 = vmatprep.subr.bf16.mxu1 (!%p140_p2), %v1593_v7  ;;  %v1469_v16 = vpack.c.bf16 (!%p140_p2), %v238_v13, %v234_v11  ;;  %v1597_v17 = vpack.c.bf16 (!%p140_p2), %v240_v15, %v236_v14  ;;  %v233_v18 = vld [vmem:[%s2835_s1 + $0x40] sm:$0xff] (!%p140_p2)  ;;  %v235_v20 = vld [vmem:[%s2835_s1 + $0x50] sm:$0xff] (!%p140_p2)  ;;  %v242_v23 = vld [vmem:[%s2835_s1 + $0x88] sm:$0xff] (!%p140_p2) }
   0xa   : > { %1468 = vmatpush1.bf16.msra.mxu0 (!%p140_p2), %v1467_v8  ;;  %v237_v19 = vld [vmem:[%s2835_s1 + $0x60] sm:$0xff] (!%p140_p2)  ;;  %v239_v22 = vld [vmem:[%s2835_s1 + $0x70] sm:$0xff] (!%p140_p2)  ;;  %v246_v24 = vld [vmem:[%s2835_s1 + $0xa8] sm:$0xff] (!%p140_p2) }
   0xb   : > { %1596 = vmatpush1.bf16.msra.mxu1 (!%p140_p2), %v1595_v12  ;;  %v1471_v21 = vpack.c.bf16 (!%p140_p2), %v237_v19, %v233_v18  ;;  %1470 = vmatprep.subr.bf16.mxu0 (!%p140_p2), %v1469_v16  ;;  %v1599_v25 = vpack.c.bf16 (!%p140_p2), %v239_v22, %v235_v20  ;;  %v1473_v26 = vpack.c.bf16 (!%p140_p2), %v246_v24, %v242_v23  ;;  %v244_v27 = vld [vmem:[%s2835_s1 + $0x98] sm:$0xff] (!%p140_p2)  ;;  %v241_v29 = vld [vmem:[%s2835_s1 + $0x80] sm:$0xff] (!%p140_p2)  ;;  %v243_v32 = vld [vmem:[%s2835_s1 + $0x90] sm:$0xff] (!%p140_p2) }
   0xc   : > { %1598 = vmatprep.subr.bf16.mxu1 (!%p140_p2), %v1597_v17  ;;  %v248_v28 = vld [vmem:[%s2835_s1 + $0xb8] sm:$0xff] (!%p140_p2)  ;;  %v245_v31 = vld [vmem:[%s2835_s1 + $0xa0] sm:$0xff] (!%p140_p2)  ;;  %v247_v33 = vld [vmem:[%s2835_s1 + $0xb0] sm:$0xff] (!%p140_p2) }
   0xd   : > { %v1601_v30 = vpack.c.bf16 %v248_v28, %v244_v27  ;;  %v1475_v34 = vpack.c.bf16 %v245_v31, %v241_v29  ;;  %v250_v35 = vld [vmem:[%s2835_s1 + $0xc8] sm:$0xff]  ;;  %v252_v37 = vld [vmem:[%s2835_s1 + $0xd8] sm:$0xff]  ;;  %v1603_v38 = vpack.c.bf16 %v247_v33, %v243_v32  ;;  %v249_v41 = vld [vmem:[%s2835_s1 + $0xc0] sm:$0xff]  ;;  %s2839_s7 = smov (!%p165_p3, %s2067_s7), 23 }
   0xe   : > { %1472 = vmatpush1.bf16.msra.mxu0 %v1471_v21  ;;  %v254_v36 = vld [vmem:[%s2835_s1 + $0xe8] sm:$0xff]  ;;  %v256_v40 = vld [vmem:[%s2835_s1 + $0xf8] sm:$0xff]  ;;  %v253_v42 = vld [vmem:[%s2835_s1 + $0xe0] sm:$0xff]  ;;  %s1396_s5 = sshll.u32 %s2839_s7, 5  ;;  %s1381_s8 = sshll.u32 %s2839_s7, 3 }
   0xf   : > { %1600 = vmatpush1.bf16.msra.mxu1 %v1599_v25  ;;  %1474 = vmatprep.subr.bf16.mxu0 %v1473_v26  ;;  %v1477_v39 = vpack.c.bf16 %v254_v36, %v250_v35  ;;  %v1605_v43 = vpack.c.bf16 %v256_v40, %v252_v37  ;;  %v251_v44 = vld [vmem:[%s2835_s1 + $0xd0] sm:$0xff]  ;;  %v258_v46 = vld [vmem:[%s2835_s1 + $0x108] sm:$0xff]  ;;  %v260_v48 = vld [vmem:[%s2835_s1 + $0x118] sm:$0xff]  ;;  %v1479_v50 = vpack.c.bf16 %v253_v42, %v249_v41  ;;  %s2175_s26 = scalar_lea.vmem %s2834_s0, %s1396_s5  ;;  %s2817_s11 = scalar_lea.vmem %s2837_s3, %s1381_s8 }
  0x10   : > { %1602 = vmatprep.subr.bf16.mxu1 %v1601_v30  ;;  %v255_v45 = vld [vmem:[%s2835_s1 + $0xf0] sm:$0xff]  ;;  %v262_v47 = vld [vmem:[%s2835_s1 + $0x128] sm:$0xff]  ;;  %v264_v49 = vld [vmem:[%s2835_s1 + $0x138] sm:$0xff] }
  0x11   : > { %v1607_v51 = vpack.c.bf16 %v255_v45, %v251_v44  ;;  %v1481_v52 = vpack.c.bf16 %v262_v47, %v258_v46  ;;  %v257_v53 = vld [vmem:[%s2835_s1 + $0x100] sm:$0xff]  ;;  %v259_v55 = vld [vmem:[%s2835_s1 + $0x110] sm:$0xff]  ;;  %v1609_v56 = vpack.c.bf16 %v264_v49, %v260_v48  ;;  %v266_v58 = vld [vmem:[%s2835_s1 + $0x148] sm:$0xff] }
  0x12   : > { %1476 = vmatpush1.bf16.msra.mxu0 %v1475_v34  ;;  %v261_v54 = vld [vmem:[%s2835_s1 + $0x120] sm:$0xff]  ;;  %v263_v57 = vld [vmem:[%s2835_s1 + $0x130] sm:$0xff]  ;;  %v270_v59 = vld [vmem:[%s2835_s1 + $0x168] sm:$0xff] }
  0x13   : > { %1604 = vmatpush1.bf16.msra.mxu1 %v1603_v38  ;;  %1478 = vmatprep.subr.bf16.mxu0 %v1477_v39  ;;  %v268_v60 = vld [vmem:[%s2835_s1 + $0x158] sm:$0xff]  ;;  %v1483_v62 = vpack.c.bf16 %v261_v54, %v257_v53  ;;  %v1611_v63 = vpack.c.bf16 %v263_v57, %v259_v55  ;;  %v1485_v0 = vpack.c.bf16 %v270_v59, %v266_v58  ;;  %v265_v1 = vld [vmem:[%s2835_s1 + $0x140] sm:$0xff]  ;;  %v267_v3 = vld [vmem:[%s2835_s1 + $0x150] sm:$0xff] }
  0x14   : > { %1606 = vmatprep.subr.bf16.mxu1 %v1605_v43  ;;  %v272_v61 = vld [vmem:[%s2835_s1 + $0x178] sm:$0xff]  ;;  %v269_v2 = vld [vmem:[%s2835_s1 + $0x160] sm:$0xff]  ;;  %v271_v5 = vld [vmem:[%s2835_s1 + $0x170] sm:$0xff] }
  0x15   : > { %v1613_v4 = vpack.c.bf16 %v272_v61, %v268_v60  ;;  %v274_v6 = vld [vmem:[%s2835_s1 + $0x188] sm:$0xff]  ;;  %v276_v8 = vld [vmem:[%s2835_s1 + $0x198] sm:$0xff]  ;;  %v1487_v10 = vpack.c.bf16 %v269_v2, %v265_v1  ;;  %v1615_v11 = vpack.c.bf16 %v271_v5, %v267_v3  ;;  %v273_v13 = vld [vmem:[%s2835_s1 + $0x180] sm:$0xff] }
  0x16   : > { %1480 = vmatpush1.bf16.msra.mxu0 %v1479_v50  ;;  %v278_v7 = vld [vmem:[%s2835_s1 + $0x1a8] sm:$0xff]  ;;  %v280_v9 = vld [vmem:[%s2835_s1 + $0x1b8] sm:$0xff]  ;;  %v277_v14 = vld [vmem:[%s2835_s1 + $0x1a0] sm:$0xff] }
  0x17   : > { %1608 = vmatpush1.bf16.msra.mxu1 %v1607_v51  ;;  %1482 = vmatprep.subr.bf16.mxu0 %v1481_v52  ;;  %v1489_v12 = vpack.c.bf16 %v278_v7, %v274_v6  ;;  %v275_v15 = vld [vmem:[%s2835_s1 + $0x190] sm:$0xff]  ;;  %v1617_v16 = vpack.c.bf16 %v280_v9, %v276_v8  ;;  %v282_v18 = vld [vmem:[%s2835_s1 + $0x1c8] sm:$0xff]  ;;  %v284_v20 = vld [vmem:[%s2835_s1 + $0x1d8] sm:$0xff]  ;;  %v1491_v22 = vpack.c.bf16 %v277_v14, %v273_v13 }
  0x18   : > { %1610 = vmatprep.subr.bf16.mxu1 %v1609_v56  ;;  %v279_v17 = vld [vmem:[%s2835_s1 + $0x1b0] sm:$0xff]  ;;  %v286_v19 = vld [vmem:[%s2835_s1 + $0x1e8] sm:$0xff]  ;;  %v288_v21 = vld [vmem:[%s2835_s1 + $0x1f8] sm:$0xff] }
  0x19   : > { %v1619_v23 = vpack.c.bf16 %v279_v17, %v275_v15  ;;  %v1493_v24 = vpack.c.bf16 %v286_v19, %v282_v18  ;;  %v281_v25 = vld [vmem:[%s2835_s1 + $0x1c0] sm:$0xff]  ;;  %v283_v27 = vld [vmem:[%s2835_s1 + $0x1d0] sm:$0xff]  ;;  %v1621_v28 = vpack.c.bf16 %v288_v21, %v284_v20  ;;  %v290_v30 = vld [vmem:[%s2835_s1 + $0x208] sm:$0xff] }
  0x1a   : > { %1484 = vmatpush1.bf16.msra.mxu0 %v1483_v62  ;;  %v285_v26 = vld [vmem:[%s2835_s1 + $0x1e0] sm:$0xff]  ;;  %v287_v29 = vld [vmem:[%s2835_s1 + $0x1f0] sm:$0xff]  ;;  %v294_v31 = vld [vmem:[%s2835_s1 + $0x228] sm:$0xff] }
  0x1b   : > { %1612 = vmatpush1.bf16.msra.mxu1 %v1611_v63  ;;  %1486 = vmatprep.subr.bf16.mxu0 %v1485_v0  ;;  %v292_v32 = vld [vmem:[%s2835_s1 + $0x218] sm:$0xff]  ;;  %v1495_v34 = vpack.c.bf16 %v285_v26, %v281_v25  ;;  %v1623_v35 = vpack.c.bf16 %v287_v29, %v283_v27  ;;  %v1497_v36 = vpack.c.bf16 %v294_v31, %v290_v30  ;;  %v289_v37 = vld [vmem:[%s2835_s1 + $0x200] sm:$0xff]  ;;  %v291_v39 = vld [vmem:[%s2835_s1 + $0x210] sm:$0xff] }
  0x1c   : > { %1614 = vmatprep.subr.bf16.mxu1 %v1613_v4  ;;  %v296_v33 = vld [vmem:[%s2835_s1 + $0x238] sm:$0xff]  ;;  %v293_v38 = vld [vmem:[%s2835_s1 + $0x220] sm:$0xff]  ;;  %v295_v41 = vld [vmem:[%s2835_s1 + $0x230] sm:$0xff] }
  0x1d   : > { %v1625_v40 = vpack.c.bf16 %v296_v33, %v292_v32  ;;  %v298_v42 = vld [vmem:[%s2835_s1 + $0x248] sm:$0xff]  ;;  %v300_v44 = vld [vmem:[%s2835_s1 + $0x258] sm:$0xff]  ;;  %v1499_v46 = vpack.c.bf16 %v293_v38, %v289_v37  ;;  %v1627_v47 = vpack.c.bf16 %v295_v41, %v291_v39  ;;  %v297_v49 = vld [vmem:[%s2835_s1 + $0x240] sm:$0xff] }
  0x1e   : > { %1488 = vmatpush1.bf16.msra.mxu0 %v1487_v10  ;;  %v302_v43 = vld [vmem:[%s2835_s1 + $0x268] sm:$0xff]  ;;  %v304_v45 = vld [vmem:[%s2835_s1 + $0x278] sm:$0xff]  ;;  %v301_v50 = vld [vmem:[%s2835_s1 + $0x260] sm:$0xff] }
  0x1f   : > { %1616 = vmatpush1.bf16.msra.mxu1 %v1615_v11  ;;  %1490 = vmatprep.subr.bf16.mxu0 %v1489_v12  ;;  %v1501_v48 = vpack.c.bf16 %v302_v43, %v298_v42  ;;  %v299_v51 = vld [vmem:[%s2835_s1 + $0x250] sm:$0xff]  ;;  %v1629_v52 = vpack.c.bf16 %v304_v45, %v300_v44  ;;  %v306_v54 = vld [vmem:[%s2835_s1 + $0x288] sm:$0xff]  ;;  %v308_v56 = vld [vmem:[%s2835_s1 + $0x298] sm:$0xff]  ;;  %v1503_v58 = vpack.c.bf16 %v301_v50, %v297_v49 }
  0x20   : > { %1618 = vmatprep.subr.bf16.mxu1 %v1617_v16  ;;  %v303_v53 = vld [vmem:[%s2835_s1 + $0x270] sm:$0xff]  ;;  %v310_v55 = vld [vmem:[%s2835_s1 + $0x2a8] sm:$0xff]  ;;  %v312_v57 = vld [vmem:[%s2835_s1 + $0x2b8] sm:$0xff] }
  0x21   : > { %v1631_v59 = vpack.c.bf16 %v303_v53, %v299_v51  ;;  %v1505_v60 = vpack.c.bf16 %v310_v55, %v306_v54  ;;  %v305_v61 = vld [vmem:[%s2835_s1 + $0x280] sm:$0xff]  ;;  %v307_v63 = vld [vmem:[%s2835_s1 + $0x290] sm:$0xff]  ;;  %v1633_v0 = vpack.c.bf16 %v312_v57, %v308_v56  ;;  %v314_v2 = vld [vmem:[%s2835_s1 + $0x2c8] sm:$0xff] }
  0x22   : > { %1492 = vmatpush1.bf16.msra.mxu0 %v1491_v22  ;;  %v309_v62 = vld [vmem:[%s2835_s1 + $0x2a0] sm:$0xff]  ;;  %v311_v1 = vld [vmem:[%s2835_s1 + $0x2b0] sm:$0xff]  ;;  %v318_v3 = vld [vmem:[%s2835_s1 + $0x2e8] sm:$0xff] }
  0x23   : > { %1620 = vmatpush1.bf16.msra.mxu1 %v1619_v23  ;;  %1494 = vmatprep.subr.bf16.mxu0 %v1493_v24  ;;  %v316_v4 = vld [vmem:[%s2835_s1 + $0x2d8] sm:$0xff]  ;;  %v1507_v6 = vpack.c.bf16 %v309_v62, %v305_v61  ;;  %v313_v7 = vld [vmem:[%s2835_s1 + $0x2c0] sm:$0xff]  ;;  %v1635_v8 = vpack.c.bf16 %v311_v1, %v307_v63  ;;  %v1509_v9 = vpack.c.bf16 %v318_v3, %v314_v2  ;;  %v315_v11 = vld [vmem:[%s2835_s1 + $0x2d0] sm:$0xff] }
  0x24   : > { %1622 = vmatprep.subr.bf16.mxu1 %v1621_v28  ;;  %v320_v5 = vld [vmem:[%s2835_s1 + $0x2f8] sm:$0xff]  ;;  %v317_v10 = vld [vmem:[%s2835_s1 + $0x2e0] sm:$0xff]  ;;  %v319_v12 = vld [vmem:[%s2835_s1 + $0x2f0] sm:$0xff] }
  0x25   : > { %v1637_v13 = vpack.c.bf16 %v320_v5, %v316_v4  ;;  %v322_v14 = vld [vmem:[%s2835_s1 + $0x308] sm:$0xff]  ;;  %v324_v17 = vld [vmem:[%s2835_s1 + $0x318] sm:$0xff]  ;;  %v1511_v19 = vpack.c.bf16 %v317_v10, %v313_v7  ;;  %v1639_v20 = vpack.c.bf16 %v319_v12, %v315_v11  ;;  %v321_v22 = vld [vmem:[%s2835_s1 + $0x300] sm:$0xff] }
  0x26   : > { %1496 = vmatpush1.bf16.msra.mxu0 %v1495_v34  ;;  %v326_v15 = vld [vmem:[%s2835_s1 + $0x328] sm:$0xff]  ;;  %v328_v18 = vld [vmem:[%s2835_s1 + $0x338] sm:$0xff]  ;;  %v325_v23 = vld [vmem:[%s2835_s1 + $0x320] sm:$0xff] }
  0x27   : > { %1624 = vmatpush1.bf16.msra.mxu1 %v1623_v35  ;;  %1498 = vmatprep.subr.bf16.mxu0 %v1497_v36  ;;  %v178_v16 = vld [vmem:[%s2175_s26 + $0x8] sm:$0xff]  ;;  %v1513_v21 = vpack.c.bf16 %v326_v15, %v322_v14  ;;  %v323_v24 = vld [vmem:[%s2835_s1 + $0x310] sm:$0xff]  ;;  %v1641_v25 = vpack.c.bf16 %v328_v18, %v324_v17  ;;  %v332_v29 = vld [vmem:[%s2835_s1 + $0x358] sm:$0xff]  ;;  %v1515_v31 = vpack.c.bf16 %v325_v23, %v321_v22 }
  0x28   : > { %1626 = vmatprep.subr.bf16.mxu1 %v1625_v40  ;;  %545 = vmatprep.mubr.f32.mxu0 %v178_v16  ;;  %v327_v26 = vld [vmem:[%s2835_s1 + $0x330] sm:$0xff]  ;;  %v330_v27 = vld [vmem:[%s2835_s1 + $0x348] sm:$0xff]  ;;  %v336_v30 = vld [vmem:[%s2835_s1 + $0x378] sm:$0xff] }
  0x29   : > { %819 = vmatprep.mubr.f32.mxu1 %v178_v16  ;;  %v334_v28 = vld [vmem:[%s2835_s1 + $0x368] sm:$0xff]  ;;  %v1643_v32 = vpack.c.bf16 %v327_v26, %v323_v24  ;;  %v329_v34 = vld [vmem:[%s2835_s1 + $0x340] sm:$0xff]  ;;  %v331_v36 = vld [vmem:[%s2835_s1 + $0x350] sm:$0xff]  ;;  %v1645_v37 = vpack.c.bf16 %v336_v30, %v332_v29 }
  0x2a   : > { %1500 = vmatpush1.bf16.msra.mxu0 %v1499_v46  ;;  %v1517_v33 = vpack.c.bf16 %v334_v28, %v330_v27  ;;  %v333_v35 = vld [vmem:[%s2835_s1 + $0x360] sm:$0xff]  ;;  %v335_v38 = vld [vmem:[%s2835_s1 + $0x370] sm:$0xff]  ;;  %v338_v39 = vld [vmem:[%s2835_s1 + $0x388] sm:$0xff] }
  0x2b   : > { %1628 = vmatpush1.bf16.msra.mxu1 %v1627_v47  ;;  %1502 = vmatprep.subr.bf16.mxu0 %v1501_v48  ;;  %v342_v40 = vld [vmem:[%s2835_s1 + $0x3a8] sm:$0xff]  ;;  %v340_v41 = vld [vmem:[%s2835_s1 + $0x398] sm:$0xff]  ;;  %v1519_v43 = vpack.c.bf16 %v333_v35, %v329_v34  ;;  %v1647_v44 = vpack.c.bf16 %v335_v38, %v331_v36  ;;  %v337_v46 = vld [vmem:[%s2835_s1 + $0x380] sm:$0xff] }
  0x2c   : > { %1630 = vmatprep.subr.bf16.mxu1 %v1629_v52  ;;  %v344_v42 = vld [vmem:[%s2835_s1 + $0x3b8] sm:$0xff]  ;;  %v1521_v45 = vpack.c.bf16 %v342_v40, %v338_v39  ;;  %v341_v47 = vld [vmem:[%s2835_s1 + $0x3a0] sm:$0xff]  ;;  %v339_v48 = vld [vmem:[%s2835_s1 + $0x390] sm:$0xff] }
  0x2d   : > { %v1649_v49 = vpack.c.bf16 %v344_v42, %v340_v41  ;;  %v343_v50 = vld [vmem:[%s2835_s1 + $0x3b0] sm:$0xff]  ;;  %v346_v51 = vld [vmem:[%s2835_s1 + $0x3c8] sm:$0xff]  ;;  %v348_v53 = vld [vmem:[%s2835_s1 + $0x3d8] sm:$0xff]  ;;  %v1523_v55 = vpack.c.bf16 %v341_v47, %v337_v46 }
  0x2e   : > { %1504 = vmatpush1.bf16.msra.mxu0 %v1503_v58  ;;  %v350_v52 = vld [vmem:[%s2835_s1 + $0x3e8] sm:$0xff]  ;;  %v352_v54 = vld [vmem:[%s2835_s1 + $0x3f8] sm:$0xff]  ;;  %v1651_v56 = vpack.c.bf16 %v343_v50, %v339_v48  ;;  %v345_v58 = vld [vmem:[%s2835_s1 + $0x3c0] sm:$0xff] }
  0x2f   : > { %1632 = vmatpush1.bf16.msra.mxu1 %v1631_v59  ;;  %1506 = vmatprep.subr.bf16.mxu0 %v1505_v60  ;;  %v1525_v57 = vpack.c.bf16 %v350_v52, %v346_v51  ;;  %v349_v59 = vld [vmem:[%s2835_s1 + $0x3e0] sm:$0xff]  ;;  %v347_v60 = vld [vmem:[%s2835_s1 + $0x3d0] sm:$0xff]  ;;  %v1653_v61 = vpack.c.bf16 %v352_v54, %v348_v53  ;;  %v354_v63 = vld [vmem:[%s2835_s1 + $0x408] sm:$0xff] }
  0x30   : > { %1634 = vmatprep.subr.bf16.mxu1 %v1633_v0  ;;  %v351_v62 = vld [vmem:[%s2835_s1 + $0x3f0] sm:$0xff]  ;;  %v358_v0 = vld [vmem:[%s2835_s1 + $0x428] sm:$0xff]  ;;  %v356_v1 = vld [vmem:[%s2835_s1 + $0x418] sm:$0xff]  ;;  %v1527_v3 = vpack.c.bf16 %v349_v59, %v345_v58 }
  0x31   : > { %v360_v2 = vld [vmem:[%s2835_s1 + $0x438] sm:$0xff]  ;;  %v1655_v4 = vpack.c.bf16 %v351_v62, %v347_v60  ;;  %v1529_v5 = vpack.c.bf16 %v358_v0, %v354_v63  ;;  %v357_v7 = vld [vmem:[%s2835_s1 + $0x420] sm:$0xff]  ;;  %v359_v10 = vld [vmem:[%s2835_s1 + $0x430] sm:$0xff] }
  0x32   : > { %1508 = vmatpush1.bf16.msra.mxu0 %v1507_v6  ;;  %v353_v6 = vld [vmem:[%s2835_s1 + $0x400] sm:$0xff]  ;;  %v362_v11 = vld [vmem:[%s2835_s1 + $0x448] sm:$0xff]  ;;  %v368_v14 = vld [vmem:[%s2835_s1 + $0x478] sm:$0xff] }
  0x33   : > { %1636 = vmatpush1.bf16.msra.mxu1 %v1635_v8  ;;  %1510 = vmatprep.subr.bf16.mxu0 %v1509_v9  ;;  %v355_v8 = vld [vmem:[%s2835_s1 + $0x410] sm:$0xff]  ;;  %v1657_v9 = vpack.c.bf16 %v360_v2, %v356_v1  ;;  %v366_v12 = vld [vmem:[%s2835_s1 + $0x468] sm:$0xff]  ;;  %v177_v15 = vld [vmem:[%s2175_s26] sm:$0xff]  ;;  %v1531_v16 = vpack.c.bf16 %v357_v7, %v353_v6 }
  0x34   : > { %1638 = vmatprep.subr.bf16.mxu1 %v1637_v13  ;;  %v364_v13 = vld [vmem:[%s2835_s1 + $0x458] sm:$0xff]  ;;  %v1659_v17 = vpack.c.bf16 %v359_v10, %v355_v8  ;;  %v1533_v18 = vpack.c.bf16 %v366_v12, %v362_v11  ;;  %v367_v23 = vld [vmem:[%s2835_s1 + $0x470] sm:$0xff]  ;;  %v370_v24 = vld [vmem:[%s2835_s1 + $0x488] sm:$0xff] }
  0x35   : > { %v1661_v22 = vpack.c.bf16 %v368_v14, %v364_v13  ;;  %v372_v26 = vld [vmem:[%s2835_s1 + $0x498] sm:$0xff]  ;;  %v182_v28 = vld [vmem:[%s2175_s26 + $0x28] sm:$0xff]  ;;  %v181_v30 = vld [vmem:[%s2175_s26 + $0x20] sm:$0xff] }
  0x36   : > { %1512 = vmatpush1.bf16.msra.mxu0 %v1511_v19  ;;  %v361_v19 = vld [vmem:[%s2835_s1 + $0x440] sm:$0xff]  ;;  %v376_v27 = vld [vmem:[%s2835_s1 + $0x4b8] sm:$0xff]  ;;  %v371_v35 = vld [vmem:[%s2835_s1 + $0x490] sm:$0xff] }
  0x37   : > { %1640 = vmatpush1.bf16.msra.mxu1 %v1639_v20  ;;  %1514 = vmatprep.subr.bf16.mxu0 %v1513_v21  ;;  %v365_v20 = vld [vmem:[%s2835_s1 + $0x460] sm:$0xff]  ;;  %v363_v21 = vld [vmem:[%s2835_s1 + $0x450] sm:$0xff]  ;;  %v1665_v36 = vpack.c.bf16 %v376_v27, %v372_v26  ;;  %v378_v38 = vld [vmem:[%s2835_s1 + $0x4c8] sm:$0xff] }
  0x38   : > { %1642 = vmatprep.subr.bf16.mxu1 %v1641_v25  ;;  %v374_v25 = vld [vmem:[%s2835_s1 + $0x4a8] sm:$0xff]  ;;  %v1535_v29 = vpack.c.bf16 %v365_v20, %v361_v19  ;;  %v373_v34 = vld [vmem:[%s2835_s1 + $0x4a0] sm:$0xff]  ;;  %v380_v40 = vld [vmem:[%s2835_s1 + $0x4d8] sm:$0xff] }
  0x39   : > { %v382_v39 = vld [vmem:[%s2835_s1 + $0x4e8] sm:$0xff]  ;;  %v384_v41 = vld [vmem:[%s2835_s1 + $0x4f8] sm:$0xff]  ;;  %v377_v47 = vld [vmem:[%s2835_s1 + $0x4c0] sm:$0xff] }
  0x3a   : > { %1516 = vmatpush1.bf16.msra.mxu0 %v1515_v31  ;;  %v1663_v31 = vpack.c.bf16 %v367_v23, %v363_v21  ;;  %v186_v42 = vld [vmem:[%s2175_s26 + $0x48] sm:$0xff]  ;;  %v1541_v46 = vpack.c.bf16 %v382_v39, %v378_v38  ;;  %v381_v48 = vld [vmem:[%s2835_s1 + $0x4e0] sm:$0xff]  ;;  %v1669_v50 = vpack.c.bf16 %v384_v41, %v380_v40  ;;  %v383_v51 = vld [vmem:[%s2835_s1 + $0x4f0] sm:$0xff] }
  0x3b   : > { %1644 = vmatpush1.bf16.msra.mxu1 %v1643_v32  ;;  %1518 = vmatprep.subr.bf16.mxu0 %v1517_v33  ;;  %v1537_v32 = vpack.c.bf16 %v374_v25, %v370_v24  ;;  %v369_v33 = vld [vmem:[%s2835_s1 + $0x480] sm:$0xff]  ;;  %v386_v52 = vld [vmem:[%s2835_s1 + $0x508] sm:$0xff]  ;;  %v388_v54 = vld [vmem:[%s2835_s1 + $0x518] sm:$0xff] }
  0x3c   : > { %1646 = vmatprep.subr.bf16.mxu1 %v1645_v37  ;;  %v375_v37 = vld [vmem:[%s2835_s1 + $0x4b0] sm:$0xff]  ;;  %v390_v53 = vld [vmem:[%s2835_s1 + $0x528] sm:$0xff]  ;;  %v189_v58 = vld [vmem:[%s2175_s26 + $0x60] sm:$0xff] }
  0x3d   : > { %v1545_v60 = vpack.c.bf16 %v390_v53, %v386_v52  ;;  %v389_v62 = vld [vmem:[%s2835_s1 + $0x520] sm:$0xff]  ;;  %v387_v63 = vld [vmem:[%s2835_s1 + $0x510] sm:$0xff]  ;;  %v394_v2 = vld [vmem:[%s2835_s1 + $0x548] sm:$0xff] }
  0x3e   : > { %1520 = vmatpush1.bf16.msra.mxu0 %v1519_v43  ;;  %v1539_v43 = vpack.c.bf16 %v373_v34, %v369_v33  ;;  %v391_v1 = vld [vmem:[%s2835_s1 + $0x530] sm:$0xff]  ;;  %v194_v6 = vld [vmem:[%s2175_s26 + $0x88] sm:$0xff]  ;;  %v193_v8 = vld [vmem:[%s2175_s26 + $0x80] sm:$0xff] }
  0x3f   : > { %1648 = vmatpush1.bf16.msra.mxu1 %v1647_v44  ;;  %1522 = vmatprep.subr.bf16.mxu0 %v1521_v45  ;;  %v185_v44 = vld [vmem:[%s2175_s26 + $0x40] sm:$0xff]  ;;  %v1667_v45 = vpack.c.bf16 %v375_v37, %v371_v35  ;;  %v395_v13 = vld [vmem:[%s2835_s1 + $0x550] sm:$0xff]  ;;  %v408_v19 = vld [vmem:[%s2835_s1 + $0x5b8] sm:$0xff] }
  0x40   : > { %1650 = vmatprep.subr.bf16.mxu1 %v1649_v49  ;;  %v379_v49 = vld [vmem:[%s2835_s1 + $0x4d0] sm:$0xff]  ;;  %v393_v11 = vld [vmem:[%s2835_s1 + $0x540] sm:$0xff]  ;;  %v198_v20 = vld [vmem:[%s2175_s26 + $0xa8] sm:$0xff] }
  0x41   : > { %v1671_v59 = vpack.c.bf16 %v383_v51, %v379_v49  ;;  %v397_v12 = vld [vmem:[%s2835_s1 + $0x560] sm:$0xff]  ;;  %v403_v27 = vld [vmem:[%s2835_s1 + $0x590] sm:$0xff]  ;;  %v416_v33 = vld [vmem:[%s2835_s1 + $0x5f8] sm:$0xff] }
  0x42   : > { %1524 = vmatpush1.bf16.msra.mxu0 %v1523_v55  ;;  %v392_v55 = vld [vmem:[%s2835_s1 + $0x538] sm:$0xff]  ;;  %v1551_v21 = vpack.c.bf16 %v397_v12, %v393_v11  ;;  %v401_v25 = vld [vmem:[%s2835_s1 + $0x580] sm:$0xff]  ;;  %v202_v34 = vld [vmem:[%s2175_s26 + $0xc8] sm:$0xff] }
  0x43   : > { %1652 = vmatpush1.bf16.msra.mxu1 %v1651_v56  ;;  %1526 = vmatprep.subr.bf16.mxu0 %v1525_v57  ;;  %v190_v56 = vld [vmem:[%s2175_s26 + $0x68] sm:$0xff]  ;;  %v1543_v57 = vpack.c.bf16 %v381_v48, %v377_v47  ;;  %v1673_v0 = vpack.c.bf16 %v392_v55, %v388_v54  ;;  %v405_v26 = vld [vmem:[%s2835_s1 + $0x5a0] sm:$0xff]  ;;  %v411_v41 = vld [vmem:[%s2835_s1 + $0x5d0] sm:$0xff] }
  0x44   : > { %1654 = vmatprep.subr.bf16.mxu1 %v1653_v61  ;;  %v385_v61 = vld [vmem:[%s2835_s1 + $0x500] sm:$0xff]  ;;  %v1555_v35 = vpack.c.bf16 %v405_v26, %v401_v25  ;;  %v424_v47 = vld [vmem:[%s2835_s1 + $0x638] sm:$0xff]  ;;  %v206_v48 = vld [vmem:[%s2175_s26 + $0xe8] sm:$0xff] }
  0x45   : > { %v1547_v7 = vpack.c.bf16 %v389_v62, %v385_v61  ;;  %v409_v39 = vld [vmem:[%s2835_s1 + $0x5c0] sm:$0xff]  ;;  %v419_v55 = vld [vmem:[%s2835_s1 + $0x610] sm:$0xff]  ;;  %v432_v61 = vld [vmem:[%s2835_s1 + $0x678] sm:$0xff] }
  0x46   : > { %1528 = vmatpush1.bf16.msra.mxu0 %v1527_v3  ;;  %v398_v3 = vld [vmem:[%s2835_s1 + $0x568] sm:$0xff]  ;;  %v413_v40 = vld [vmem:[%s2835_s1 + $0x5e0] sm:$0xff]  ;;  %v440_v11 = vld [vmem:[%s2835_s1 + $0x6b8] sm:$0xff] }
  0x47   : > { %1656 = vmatpush1.bf16.msra.mxu1 %v1655_v4  ;;  %1530 = vmatprep.subr.bf16.mxu0 %v1529_v5  ;;  %v396_v4 = vld [vmem:[%s2835_s1 + $0x558] sm:$0xff]  ;;  %v1549_v10 = vpack.c.bf16 %v398_v3, %v394_v2  ;;  %v1559_v49 = vpack.c.bf16 %v413_v40, %v409_v39  ;;  %v417_v53 = vld [vmem:[%s2835_s1 + $0x600] sm:$0xff]  ;;  %v210_v62 = vld [vmem:[%s2175_s26 + $0x108] sm:$0xff] }
  0x48   : > { %1658 = vmatprep.subr.bf16.mxu1 %v1657_v9  ;;  %v400_v5 = vld [vmem:[%s2835_s1 + $0x578] sm:$0xff]  ;;  %v1675_v9 = vpack.c.bf16 %v391_v1, %v387_v63  ;;  %v421_v54 = vld [vmem:[%s2835_s1 + $0x620] sm:$0xff]  ;;  %v214_v12 = vld [vmem:[%s2175_s26 + $0x128] sm:$0xff] }
  0x49   : > { %546 = vmatmul.mubr.f32.vlgmr.msra.gmra.mrb[0].mxu0 %v177_v15  ;;  %v1677_v14 = vpack.c.bf16 %v400_v5, %v396_v4  ;;  %v1563_v63 = vpack.c.bf16 %v421_v54, %v417_v53  ;;  %v425_v3 = vld [vmem:[%s2835_s1 + $0x640] sm:$0xff]  ;;  %v427_v5 = vld [vmem:[%s2835_s1 + $0x650] sm:$0xff]  ;;  %v448_v25 = vld [vmem:[%s2835_s1 + $0x6f8] sm:$0xff] }
  0x4a   : > { %1532 = vmatpush1.bf16.msra.mxu0 %v1531_v16  ;;  %820 = vmatmul.mubr.f32.vlgmr.msra.gmra.mrb[0].mxu1 %v177_v15  ;;  %v399_v15 = vld [vmem:[%s2835_s1 + $0x570] sm:$0xff]  ;;  %v402_v16 = vld [vmem:[%s2835_s1 + $0x588] sm:$0xff]  ;;  %v429_v4 = vld [vmem:[%s2835_s1 + $0x660] sm:$0xff] }
  0x4b   : > { %1660 = vmatpush1.bf16.msra.mxu1 %v1659_v17  ;;  %1534 = vmatprep.subr.bf16.mxu0 %v1533_v18  ;;  %v406_v17 = vld [vmem:[%s2835_s1 + $0x5a8] sm:$0xff]  ;;  %v404_v18 = vld [vmem:[%s2835_s1 + $0x598] sm:$0xff]  ;;  %v1679_v23 = vpack.c.bf16 %v399_v15, %v395_v13  ;;  %v1567_v13 = vpack.c.bf16 %v429_v4, %v425_v3 }
  0x4c   : > { %1662 = vmatprep.subr.bf16.mxu1 %v1661_v22  ;;  %551 = vmatprep.mubr.f32.mxu0 %v182_v28  ;;  %v197_v22 = vld [vmem:[%s2175_s26 + $0xa0] sm:$0xff]  ;;  %v1553_v24 = vpack.c.bf16 %v406_v17, %v402_v16  ;;  %v218_v26 = vld [vmem:[%s2175_s26 + $0x148] sm:$0xff]  ;;  %v456_v39 = vld [vmem:[%s2835_s1 + $0x738] sm:$0xff] }
  0x4d   : > { %825 = vmatprep.mubr.f32.mxu1 %v182_v28  ;;  %552 = vmatmul.mubr.f32.gmra.mrb[2].mxu0 %v181_v30  ;;  %v1681_v28 = vpack.c.bf16 %v408_v19, %v404_v18  ;;  %v433_v17 = vld [vmem:[%s2835_s1 + $0x680] sm:$0xff]  ;;  %v435_v19 = vld [vmem:[%s2835_s1 + $0x690] sm:$0xff]  ;;  %v222_v40 = vld [vmem:[%s2175_s26 + $0x168] sm:$0xff] }
  0x4e   : > { %1536 = vmatpush1.bf16.msra.mxu0 %v1535_v29  ;;  %826 = vmatmul.mubr.f32.gmra.mrb[2].mxu1 %v181_v30  ;;  %v407_v29 = vld [vmem:[%s2835_s1 + $0x5b0] sm:$0xff]  ;;  %v410_v30 = vld [vmem:[%s2835_s1 + $0x5c8] sm:$0xff]  ;;  %v437_v18 = vld [vmem:[%s2835_s1 + $0x6a0] sm:$0xff] }
  0x4f   : > { %1664 = vmatpush1.bf16.msra.mxu1 %v1663_v31  ;;  %1538 = vmatprep.subr.bf16.mxu0 %v1537_v32  ;;  %v414_v31 = vld [vmem:[%s2835_s1 + $0x5e8] sm:$0xff]  ;;  %v412_v32 = vld [vmem:[%s2835_s1 + $0x5d8] sm:$0xff]  ;;  %v1683_v37 = vpack.c.bf16 %v407_v29, %v403_v27  ;;  %v1571_v27 = vpack.c.bf16 %v437_v18, %v433_v17  ;;  %v473_v18 = vld [vmem:[%s2835_s1 + $0x7c0] sm:$0xff] }
  0x50   : > { %1666 = vmatprep.subr.bf16.mxu1 %v1665_v36  ;;  %557 = vmatprep.mubr.f32.mxu0 %v186_v42  ;;  %v201_v36 = vld [vmem:[%s2175_s26 + $0xc0] sm:$0xff]  ;;  %v1557_v38 = vpack.c.bf16 %v414_v31, %v410_v30  ;;  %v464_v53 = vld [vmem:[%s2835_s1 + $0x778] sm:$0xff] }
  0x51   : > { %831 = vmatprep.mubr.f32.mxu1 %v186_v42  ;;  %558 = vmatmul.mubr.f32.gmra.mrb[4].mxu0 %v185_v44  ;;  %v1685_v42 = vpack.c.bf16 %v416_v33, %v412_v32  ;;  %v441_v31 = vld [vmem:[%s2835_s1 + $0x6c0] sm:$0xff]  ;;  %v443_v33 = vld [vmem:[%s2835_s1 + $0x6d0] sm:$0xff]  ;;  %v180_v54 = vld [vmem:[%s2175_s26 + $0x18] sm:$0xff] }
  0x52   : > { %1540 = vmatpush1.bf16.msra.mxu0 %v1539_v43  ;;  %832 = vmatmul.mubr.f32.gmra.mrb[4].mxu1 %v185_v44  ;;  %v415_v43 = vld [vmem:[%s2835_s1 + $0x5f0] sm:$0xff]  ;;  %v418_v44 = vld [vmem:[%s2835_s1 + $0x608] sm:$0xff]  ;;  %v445_v32 = vld [vmem:[%s2835_s1 + $0x6e0] sm:$0xff] }
  0x53   : > { %1668 = vmatpush1.bf16.msra.mxu1 %v1667_v45  ;;  %1542 = vmatprep.subr.bf16.mxu0 %v1541_v46  ;;  %v422_v45 = vld [vmem:[%s2835_s1 + $0x628] sm:$0xff]  ;;  %v420_v46 = vld [vmem:[%s2835_s1 + $0x618] sm:$0xff]  ;;  %v1687_v51 = vpack.c.bf16 %v415_v43, %v411_v41  ;;  %v1575_v41 = vpack.c.bf16 %v445_v32, %v441_v31  ;;  %v179_v32 = vld [vmem:[%s2175_s26 + $0x10] sm:$0xff] }
  0x54   : > { %1670 = vmatprep.subr.bf16.mxu1 %v1669_v50  ;;  %563 = vmatprep.mubr.f32.mxu0 %v190_v56  ;;  %v205_v50 = vld [vmem:[%s2175_s26 + $0xe0] sm:$0xff]  ;;  %v1561_v52 = vpack.c.bf16 %v422_v45, %v418_v44  ;;  %v1120_v31 = vld [vmem:[%s2836_s2 + $0x98] sm:$0xff] }
  0x55   : > { %837 = vmatprep.mubr.f32.mxu1 %v190_v56  ;;  %564 = vmatmul.mubr.f32.gmra.mrb[6].mxu0 %v189_v58  ;;  %v1689_v56 = vpack.c.bf16 %v424_v47, %v420_v46  ;;  %v449_v45 = vld [vmem:[%s2835_s1 + $0x700] sm:$0xff]  ;;  %v451_v47 = vld [vmem:[%s2835_s1 + $0x710] sm:$0xff] }
  0x56   : > { %1544 = vmatpush1.bf16.msra.mxu0 %v1543_v57  ;;  %838 = vmatmul.mubr.f32.gmra.mrb[6].mxu1 %v189_v58  ;;  %v423_v57 = vld [vmem:[%s2835_s1 + $0x630] sm:$0xff]  ;;  %v426_v58 = vld [vmem:[%s2835_s1 + $0x648] sm:$0xff]  ;;  %v453_v46 = vld [vmem:[%s2835_s1 + $0x720] sm:$0xff] }
  0x57   : > { %1672 = vmatpush1.bf16.msra.mxu1 %v1671_v59  ;;  %1546 = vmatprep.subr.bf16.mxu0 %v1545_v60  ;;  %v430_v59 = vld [vmem:[%s2835_s1 + $0x668] sm:$0xff]  ;;  %v428_v60 = vld [vmem:[%s2835_s1 + $0x658] sm:$0xff]  ;;  %v1691_v1 = vpack.c.bf16 %v423_v57, %v419_v55  ;;  %v1579_v55 = vpack.c.bf16 %v453_v46, %v449_v45  ;;  %v1123_v46 = vld [vmem:[%s2836_s2 + $0xb0] sm:$0xff] }
  0x58   : > { %1674 = vmatprep.subr.bf16.mxu1 %v1673_v0  ;;  %569 = vmatprep.mubr.f32.mxu0 %v194_v6  ;;  %v209_v0 = vld [vmem:[%s2175_s26 + $0x100] sm:$0xff]  ;;  %v1565_v2 = vpack.c.bf16 %v430_v59, %v426_v58  ;;  %v1106_v45 = vld [vmem:[%s2836_s2 + $0x28] sm:$0xff] }
  0x59   : > { %843 = vmatprep.mubr.f32.mxu1 %v194_v6  ;;  %570 = vmatmul.mubr.f32.gmra.mrb[8].mxu0 %v193_v8  ;;  %v1693_v6 = vpack.c.bf16 %v432_v61, %v428_v60  ;;  %v457_v58 = vld [vmem:[%s2835_s1 + $0x740] sm:$0xff]  ;;  %v459_v60 = vld [vmem:[%s2835_s1 + $0x750] sm:$0xff] }
  0x5a   : > { %1548 = vmatpush1.bf16.msra.mxu0 %v1547_v7  ;;  %844 = vmatmul.mubr.f32.gmra.mrb[8].mxu1 %v193_v8  ;;  %v431_v7 = vld [vmem:[%s2835_s1 + $0x670] sm:$0xff]  ;;  %v434_v8 = vld [vmem:[%s2835_s1 + $0x688] sm:$0xff]  ;;  %v461_v59 = vld [vmem:[%s2835_s1 + $0x760] sm:$0xff] }
  0x5b   : > { %1676 = vmatpush1.bf16.msra.mxu1 %v1675_v9  ;;  %1550 = vmatprep.subr.bf16.mxu0 %v1549_v10  ;;  %v438_v9 = vld [vmem:[%s2835_s1 + $0x6a8] sm:$0xff]  ;;  %v436_v10 = vld [vmem:[%s2835_s1 + $0x698] sm:$0xff]  ;;  %v1695_v15 = vpack.c.bf16 %v431_v7, %v427_v5  ;;  %v1583_v3 = vpack.c.bf16 %v461_v59, %v457_v58  ;;  %v469_v7 = vld [vmem:[%s2835_s1 + $0x7a0] sm:$0xff] }
  0x5c   : > { %1678 = vmatprep.subr.bf16.mxu1 %v1677_v14  ;;  %575 = vmatprep.mubr.f32.mxu0 %v198_v20  ;;  %v213_v14 = vld [vmem:[%s2175_s26 + $0x120] sm:$0xff]  ;;  %v1569_v16 = vpack.c.bf16 %v438_v9, %v434_v8  ;;  %v467_v8 = vld [vmem:[%s2835_s1 + $0x790] sm:$0xff] }
  0x5d   : > { %849 = vmatprep.mubr.f32.mxu1 %v198_v20  ;;  %576 = vmatmul.mubr.f32.gmra.mrb[10].mxu0 %v197_v22  ;;  %v1697_v20 = vpack.c.bf16 %v440_v11, %v436_v10  ;;  %v471_v10 = vld [vmem:[%s2835_s1 + $0x7b0] sm:$0xff]  ;;  %v474_v11 = vld [vmem:[%s2835_s1 + $0x7c8] sm:$0xff] }
  0x5e   : > { %1552 = vmatpush1.bf16.msra.mxu0 %v1551_v21  ;;  %850 = vmatmul.mubr.f32.gmra.mrb[10].mxu1 %v197_v22  ;;  %v439_v21 = vld [vmem:[%s2835_s1 + $0x6b0] sm:$0xff]  ;;  %v442_v22 = vld [vmem:[%s2835_s1 + $0x6c8] sm:$0xff] }
  0x5f   : > { %1680 = vmatpush1.bf16.msra.mxu1 %v1679_v23  ;;  %1554 = vmatprep.subr.bf16.mxu0 %v1553_v24  ;;  %v446_v23 = vld [vmem:[%s2835_s1 + $0x6e8] sm:$0xff]  ;;  %v444_v24 = vld [vmem:[%s2835_s1 + $0x6d8] sm:$0xff]  ;;  %v1699_v29 = vpack.c.bf16 %v439_v21, %v435_v19  ;;  %v477_v19 = vld [vmem:[%s2835_s1 + $0x7e0] sm:$0xff] }
  0x60   : > { %1682 = vmatprep.subr.bf16.mxu1 %v1681_v28  ;;  %581 = vmatprep.mubr.f32.mxu0 %v202_v34  ;;  %v217_v28 = vld [vmem:[%s2175_s26 + $0x140] sm:$0xff]  ;;  %v1573_v30 = vpack.c.bf16 %v446_v23, %v442_v22  ;;  %v479_v22 = vld [vmem:[%s2835_s1 + $0x7f0] sm:$0xff] }
  0x61   : > { %855 = vmatprep.mubr.f32.mxu1 %v202_v34  ;;  %582 = vmatmul.mubr.f32.gmra.mrb[12].mxu0 %v201_v36  ;;  %v1701_v34 = vpack.c.bf16 %v448_v25, %v444_v24  ;;  %v1117_v23 = vld [vmem:[%s2836_s2 + $0x80] sm:$0xff]  ;;  %v1118_v24 = vld [vmem:[%s2836_s2 + $0x88] sm:$0xff]  ;;  %v1591_v25 = vpack.c.bf16 %v477_v19, %v473_v18  ;;  %v215_v18 = vld [vmem:[%s2175_s26 + $0x130] sm:$0xff] }
  0x62   : > { %1556 = vmatpush1.bf16.msra.mxu0 %v1555_v35  ;;  %856 = vmatmul.mubr.f32.gmra.mrb[12].mxu1 %v201_v36  ;;  %v447_v35 = vld [vmem:[%s2835_s1 + $0x6f0] sm:$0xff]  ;;  %v450_v36 = vld [vmem:[%s2835_s1 + $0x708] sm:$0xff]  ;;  %v220_v19 = vld [vmem:[%s2175_s26 + $0x158] sm:$0xff] }
  0x63   : > { %1684 = vmatpush1.bf16.msra.mxu1 %v1683_v37  ;;  %1558 = vmatprep.subr.bf16.mxu0 %v1557_v38  ;;  %v454_v37 = vld [vmem:[%s2835_s1 + $0x728] sm:$0xff]  ;;  %v452_v38 = vld [vmem:[%s2835_s1 + $0x718] sm:$0xff]  ;;  %v1703_v43 = vpack.c.bf16 %v447_v35, %v443_v33 }
  0x64   : > { %1686 = vmatprep.subr.bf16.mxu1 %v1685_v42  ;;  %587 = vmatprep.mubr.f32.mxu0 %v206_v48  ;;  %v221_v42 = vld [vmem:[%s2175_s26 + $0x160] sm:$0xff]  ;;  %v1577_v44 = vpack.c.bf16 %v454_v37, %v450_v36  ;;  %v184_v33 = vld [vmem:[%s2175_s26 + $0x38] sm:$0xff]  ;;  %v1103_v36 = vld [vmem:[%s2836_s2 + $0x10] sm:$0xff] }
  0x65   : > { %861 = vmatprep.mubr.f32.mxu1 %v206_v48  ;;  %588 = vmatmul.mubr.f32.gmra.mrb[14].mxu0 %v205_v50  ;;  %v1705_v48 = vpack.c.bf16 %v456_v39, %v452_v38  ;;  %v1104_v37 = vld [vmem:[%s2836_s2 + $0x18] sm:$0xff]  ;;  %v1121_v38 = vld [vmem:[%s2836_s2 + $0xa0] sm:$0xff]  ;;  %v1122_v39 = vld [vmem:[%s2836_s2 + $0xa8] sm:$0xff] }
  0x66   : > { %1560 = vmatpush1.bf16.msra.mxu0 %v1559_v49  ;;  %862 = vmatmul.mubr.f32.gmra.mrb[14].mxu1 %v205_v50  ;;  %v455_v49 = vld [vmem:[%s2835_s1 + $0x730] sm:$0xff]  ;;  %v458_v50 = vld [vmem:[%s2835_s1 + $0x748] sm:$0xff] }
  0x67   : > { %1688 = vmatpush1.bf16.msra.mxu1 %v1687_v51  ;;  %1562 = vmatprep.subr.bf16.mxu0 %v1561_v52  ;;  %v462_v51 = vld [vmem:[%s2835_s1 + $0x768] sm:$0xff]  ;;  %v460_v52 = vld [vmem:[%s2835_s1 + $0x758] sm:$0xff] }
  0x68   : > { %1690 = vmatprep.subr.bf16.mxu1 %v1689_v56  ;;  %593 = vmatprep.mubr.f32.mxu0 %v210_v62  ;;  %v1707_v56 = vpack.c.bf16 %v455_v49, %v451_v47  ;;  %v1581_v57 = vpack.c.bf16 %v462_v51, %v458_v50  ;;  %v1709_v61 = vpack.c.bf16 %v464_v53, %v460_v52  ;;  %v1124_v47 = vld [vmem:[%s2836_s2 + $0xb8] sm:$0xff]  ;;  %v1107_v52 = vld [vmem:[%s2836_s2 + $0x30] sm:$0xff] }
  0x69   : > { %867 = vmatprep.mubr.f32.mxu1 %v210_v62  ;;  %594 = vmatmul.mubr.f32.gmra.mrb[16].mxu0 %v209_v0  ;;  %v463_v62 = vld [vmem:[%s2835_s1 + $0x770] sm:$0xff]  ;;  %v192_v49 = vld [vmem:[%s2175_s26 + $0x78] sm:$0xff]  ;;  %v1733_v51 = vpack.c.bf16 %v1124_v47, %v1123_v46 }
  0x6a   : > { %1564 = vmatpush1.bf16.msra.mxu0 %v1563_v63  ;;  %868 = vmatmul.mubr.f32.gmra.mrb[16].mxu1 %v209_v0  ;;  %v466_v63 = vld [vmem:[%s2835_s1 + $0x788] sm:$0xff]  ;;  %v1711_v4 = vpack.c.bf16 %v463_v62, %v459_v60  ;;  %v1108_v53 = vld [vmem:[%s2836_s2 + $0x38] sm:$0xff]  ;;  %v1109_v60 = vld [vmem:[%s2836_s2 + $0x40] sm:$0xff] }
  0x6b   : > { %1692 = vmatpush1.bf16.msra.mxu1 %v1691_v1  ;;  %1566 = vmatprep.subr.bf16.mxu0 %v1565_v2  ;;  %v470_v0 = vld [vmem:[%s2835_s1 + $0x7a8] sm:$0xff]  ;;  %v468_v1 = vld [vmem:[%s2835_s1 + $0x798] sm:$0xff]  ;;  %v1735_v58 = vpack.c.bf16 %v1108_v53, %v1107_v52  ;;  %v1127_v62 = vld [vmem:[%s2836_s2 + $0xd0] sm:$0xff] }
  0x6c   : > { %1694 = vmatprep.subr.bf16.mxu1 %v1693_v6  ;;  %599 = vmatprep.mubr.f32.mxu0 %v214_v12  ;;  %v472_v2 = vld [vmem:[%s2835_s1 + $0x7b8] sm:$0xff]  ;;  %v1585_v5 = vpack.c.bf16 %v470_v0, %v466_v63  ;;  %v465_v6 = vld [vmem:[%s2835_s1 + $0x780] sm:$0xff]  ;;  %v195_v0 = vld [vmem:[%s2175_s26 + $0x90] sm:$0xff] }
  0x6d   : > { %873 = vmatprep.mubr.f32.mxu1 %v214_v12  ;;  %600 = vmatmul.mubr.f32.gmra.mrb[18].mxu0 %v213_v14  ;;  %v1713_v9 = vpack.c.bf16 %v472_v2, %v468_v1  ;;  %v478_v12 = vld [vmem:[%s2835_s1 + $0x7e8] sm:$0xff]  ;;  %v1128_v63 = vld [vmem:[%s2836_s2 + $0xd8] sm:$0xff] }
  0x6e   : > { %1568 = vmatpush1.bf16.msra.mxu0 %v1567_v13  ;;  %874 = vmatmul.mubr.f32.gmra.mrb[18].mxu1 %v213_v14  ;;  %v476_v13 = vld [vmem:[%s2835_s1 + $0x7d8] sm:$0xff]  ;;  %v1589_v17 = vpack.c.bf16 %v478_v12, %v474_v11  ;;  %v203_v12 = vld [vmem:[%s2175_s26 + $0xd0] sm:$0xff] }
  0x6f   : > { %1696 = vmatpush1.bf16.msra.mxu1 %v1695_v15  ;;  %1570 = vmatprep.subr.bf16.mxu0 %v1569_v16  ;;  %v480_v14 = vld [vmem:[%s2835_s1 + $0x7f8] sm:$0xff]  ;;  %v1587_v15 = vpack.c.bf16 %v469_v7, %v465_v6  ;;  %v1715_v16 = vpack.c.bf16 %v471_v10, %v467_v8  ;;  %v1129_v6 = vld [vmem:[%s2836_s2 + $0xe0] sm:$0xff]  ;;  %v1130_v7 = vld [vmem:[%s2836_s2 + $0xe8] sm:$0xff] }
  0x70   : > { %1698 = vmatprep.subr.bf16.mxu1 %v1697_v20  ;;  %605 = vmatprep.mubr.f32.mxu0 %v218_v26  ;;  %v475_v20 = vld [vmem:[%s2835_s1 + $0x7d0] sm:$0xff]  ;;  %v1717_v21 = vpack.c.bf16 %v480_v14, %v476_v13  ;;  %v200_v1 = vld [vmem:[%s2175_s26 + $0xb8] sm:$0xff]  ;;  %v1745_v11 = vpack.c.bf16 %v1130_v7, %v1129_v6 }
  0x71   : > { %879 = vmatprep.mubr.f32.mxu1 %v218_v26  ;;  %606 = vmatmul.mubr.f32.gmra.mrb[20].mxu0 %v217_v28  ;;  %v1719_v26 = vpack.c.bf16 %v479_v22, %v475_v20  ;;  %v199_v8 = vld [vmem:[%s2175_s26 + $0xb0] sm:$0xff]  ;;  %v208_v13 = vld [vmem:[%s2175_s26 + $0xf8] sm:$0xff] }
  0x72   : > { %1572 = vmatpush1.bf16.msra.mxu0 %v1571_v27  ;;  %880 = vmatmul.mubr.f32.gmra.mrb[20].mxu1 %v217_v28  ;;  %v1721_v27 = vpack.c.bf16 %v1118_v24, %v1117_v23  ;;  %v1101_v28 = vld [vmem:[%s2836_s2] sm:$0xff]  ;;  %v207_v14 = vld [vmem:[%s2175_s26 + $0xf0] sm:$0xff]  ;;  %v1114_v24 = vld [vmem:[%s2836_s2 + $0x68] sm:$0xff] }
  0x73   : > { %1700 = vmatpush1.bf16.msra.mxu1 %v1699_v29  ;;  %1574 = vmatprep.subr.bf16.mxu0 %v1573_v30  ;;  %v1102_v29 = vld [vmem:[%s2836_s2 + $0x8] sm:$0xff]  ;;  %v1119_v30 = vld [vmem:[%s2836_s2 + $0x90] sm:$0xff]  ;;  %v1113_v23 = vld [vmem:[%s2836_s2 + $0x60] sm:$0xff] }
  0x74   : > { %1702 = vmatprep.subr.bf16.mxu1 %v1701_v34  ;;  %611 = vmatprep.mubr.f32.mxu0 %v222_v40  ;;  %v1723_v34 = vpack.c.bf16 %v1102_v29, %v1101_v28  ;;  %v1725_v35 = vpack.c.bf16 %v1120_v31, %v1119_v30  ;;  %v219_v20 = vld [vmem:[%s2175_s26 + $0x150] sm:$0xff]  ;;  %v1116_v30 = vld [vmem:[%s2836_s2 + $0x78] sm:$0xff] }
  0x75   : > { %885 = vmatprep.mubr.f32.mxu1 %v222_v40  ;;  %612 = vmatmul.mubr.f32.gmra.mrb[22].mxu0 %v221_v42  ;;  %v183_v40 = vld [vmem:[%s2175_s26 + $0x30] sm:$0xff] }
  0x76   : > { %1576 = vmatpush1.bf16.msra.mxu0 %v1575_v41  ;;  %886 = vmatmul.mubr.f32.gmra.mrb[22].mxu1 %v221_v42  ;;  %v188_v41 = vld [vmem:[%s2175_s26 + $0x58] sm:$0xff]  ;;  %v1727_v42 = vpack.c.bf16 %v1104_v37, %v1103_v36  ;;  %v223_v22 = vld [vmem:[%s2175_s26 + $0x170] sm:$0xff] }
  0x77   : > { %1704 = vmatpush1.bf16.msra.mxu1 %v1703_v43  ;;  %1578 = vmatprep.subr.bf16.mxu0 %v1577_v44  ;;  %v1729_v43 = vpack.c.bf16 %v1122_v39, %v1121_v38  ;;  %v1105_v44 = vld [vmem:[%s2836_s2 + $0x20] sm:$0xff]  ;;  %v1115_v29 = vld [vmem:[%s2836_s2 + $0x70] sm:$0xff] }
  0x78   : > { %1706 = vmatprep.subr.bf16.mxu1 %v1705_v48  ;;  %682 = vmatprep.mubr.f32.mxu0 %v180_v54  ;;  %v187_v48 = vld [vmem:[%s2175_s26 + $0x50] sm:$0xff]  ;;  %v1731_v50 = vpack.c.bf16 %v1106_v45, %v1105_v44  ;;  %v1751_v31 = vpack.c.bf16 %v1116_v30, %v1115_v29 }
  0x79   : > { %956 = vmatprep.mubr.f32.mxu1 %v180_v54  ;;  %v1125_v54 = vld [vmem:[%s2836_s2 + $0xc0] sm:$0xff] }
  0x7a   : > { %1580 = vmatpush1.bf16.msra.mxu0 %v1579_v55  ;;  %v1126_v55 = vld [vmem:[%s2836_s2 + $0xc8] sm:$0xff] }
  0x7b   : > { %1708 = vmatpush1.bf16.msra.mxu1 %v1707_v56  ;;  %1582 = vmatprep.subr.bf16.mxu0 %v1581_v57  ;;  %v191_v56 = vld [vmem:[%s2175_s26 + $0x70] sm:$0xff]  ;;  %v196_v57 = vld [vmem:[%s2175_s26 + $0x98] sm:$0xff]  ;;  %v1737_v59 = vpack.c.bf16 %v1126_v55, %v1125_v54 }
  0x7c   : > { %1710 = vmatprep.subr.bf16.mxu1 %v1709_v61  ;;  %v1110_v61 = vld [vmem:[%s2836_s2 + $0x48] sm:$0xff] }
  0x7d   : > { %v1739_v2 = vpack.c.bf16 %v1110_v61, %v1109_v60 }
  0x7e   : > { %1584 = vmatpush1.bf16.msra.mxu0 %v1583_v3  ;;  %v1741_v3 = vpack.c.bf16 %v1128_v63, %v1127_v62 }
  0x7f   : > { %1712 = vmatpush1.bf16.msra.mxu1 %v1711_v4  ;;  %1586 = vmatprep.subr.bf16.mxu0 %v1585_v5  ;;  %v1111_v4 = vld [vmem:[%s2836_s2 + $0x50] sm:$0xff]  ;;  %v1112_v5 = vld [vmem:[%s2836_s2 + $0x58] sm:$0xff] }
  0x80   : > { %1714 = vmatprep.subr.bf16.mxu1 %v1713_v9  ;;  %v204_v9 = vld [vmem:[%s2175_s26 + $0xd8] sm:$0xff]  ;;  %v1743_v10 = vpack.c.bf16 %v1112_v5, %v1111_v4 }
  0x82   : > { %1588 = vmatpush1.bf16.msra.mxu0 %v1587_v15  ;;  %v212_v15 = vld [vmem:[%s2175_s26 + $0x118] sm:$0xff] }
  0x83   : > { %1716 = vmatpush1.bf16.msra.mxu1 %v1715_v16  ;;  %1590 = vmatprep.subr.bf16.mxu0 %v1589_v17  ;;  %v211_v16 = vld [vmem:[%s2175_s26 + $0x110] sm:$0xff]  ;;  %v216_v17 = vld [vmem:[%s2175_s26 + $0x138] sm:$0xff] }
  0x84   : > { %1718 = vmatprep.subr.bf16.mxu1 %v1717_v21  ;;  %v224_v21 = vld [vmem:[%s2175_s26 + $0x178] sm:$0xff] }
  0x86   : > { %1592 = vmatpush1.bf16.msra.mxu0 %v1591_v25  ;;  %v1747_v25 = vpack.c.bf16 %v1114_v24, %v1113_v23 }
  0x87   : > { %1720 = vmatpush1.bf16.msra.mxu1 %v1719_v26  ;;  %1722 = vmatprep.subr.bf16.mxu0 %v1721_v27  ;;  %v1131_v26 = vld [vmem:[%s2836_s2 + $0xf0] sm:$0xff] }
  0x88   : > { %1753 = vmatprep.subr.bf16.mxu1 %v1721_v27  ;;  %v1132_v27 = vld [vmem:[%s2836_s2 + $0xf8] sm:$0xff] }
  0x89   : > { %683 = vmatmul.mubr.f32.vlgmr.msra.gmra.mrb[0].mxu0 %v179_v32  ;;  %v1749_v28 = vpack.c.bf16 %v1132_v27, %v1131_v26 }
  0x8a   : > { %957 = vmatmul.mubr.f32.vlgmr.msra.gmra.mrb[0].mxu1 %v179_v32  ;;  %688 = vmatprep.mubr.f32.mxu0 %v184_v33 }
  0x8b   : > { %962 = vmatprep.mubr.f32.mxu1 %v184_v33  ;;  %1724 = vmatpush3.bf16.msra.mxu0 %v1723_v34 }
  0x8c   : > { %1726 = vmatprep.subr.bf16.mxu0 %v1725_v35  ;;  %1761 = vmatpush3.bf16.msra.mxu1 %v1723_v34 }
  0x8d   : > { %689 = vmatmul.mubr.f32.gmra.mrb[2].mxu0 %v183_v40  ;;  %1754 = vmatprep.subr.bf16.mxu1 %v1725_v35 }
  0x8e   : > { %963 = vmatmul.mubr.f32.gmra.mrb[2].mxu1 %v183_v40  ;;  %694 = vmatprep.mubr.f32.mxu0 %v188_v41 }
  0x8f   : > { %968 = vmatprep.mubr.f32.mxu1 %v188_v41  ;;  %1728 = vmatpush3.bf16.msra.mxu0 %v1727_v42 }
  0x90   : > { %1730 = vmatprep.subr.bf16.mxu0 %v1729_v43  ;;  %1762 = vmatpush3.bf16.msra.mxu1 %v1727_v42 }
  0x91   : > { %695 = vmatmul.mubr.f32.gmra.mrb[4].mxu0 %v187_v48  ;;  %1755 = vmatprep.subr.bf16.mxu1 %v1729_v43 }
  0x92   : > { %969 = vmatmul.mubr.f32.gmra.mrb[4].mxu1 %v187_v48  ;;  %700 = vmatprep.mubr.f32.mxu0 %v192_v49 }
  0x93   : > { %974 = vmatprep.mubr.f32.mxu1 %v192_v49  ;;  %1732 = vmatpush3.bf16.msra.mxu0 %v1731_v50 }
  0x94   : > { %1734 = vmatprep.subr.bf16.mxu0 %v1733_v51  ;;  %1763 = vmatpush3.bf16.msra.mxu1 %v1731_v50 }
  0x95   : > { %701 = vmatmul.mubr.f32.gmra.mrb[6].mxu0 %v191_v56  ;;  %1756 = vmatprep.subr.bf16.mxu1 %v1733_v51 }
  0x96   : > { %975 = vmatmul.mubr.f32.gmra.mrb[6].mxu1 %v191_v56  ;;  %706 = vmatprep.mubr.f32.mxu0 %v196_v57 }
  0x97   : > { %980 = vmatprep.mubr.f32.mxu1 %v196_v57  ;;  %1736 = vmatpush3.bf16.msra.mxu0 %v1735_v58 }
  0x98   : > { %1738 = vmatprep.subr.bf16.mxu0 %v1737_v59  ;;  %1764 = vmatpush3.bf16.msra.mxu1 %v1735_v58 }
  0x99   : > { %707 = vmatmul.mubr.f32.gmra.mrb[8].mxu0 %v195_v0  ;;  %1757 = vmatprep.subr.bf16.mxu1 %v1737_v59 }
  0x9a   : > { %981 = vmatmul.mubr.f32.gmra.mrb[8].mxu1 %v195_v0  ;;  %712 = vmatprep.mubr.f32.mxu0 %v200_v1 }
  0x9b   : > { %986 = vmatprep.mubr.f32.mxu1 %v200_v1  ;;  %1740 = vmatpush3.bf16.msra.mxu0 %v1739_v2 }
  0x9c   : > { %1742 = vmatprep.subr.bf16.mxu0 %v1741_v3  ;;  %1765 = vmatpush3.bf16.msra.mxu1 %v1739_v2 }
  0x9d   : > { %713 = vmatmul.mubr.f32.gmra.mrb[10].mxu0 %v199_v8  ;;  %1758 = vmatprep.subr.bf16.mxu1 %v1741_v3 }
  0x9e   : > { %987 = vmatmul.mubr.f32.gmra.mrb[10].mxu1 %v199_v8  ;;  %718 = vmatprep.mubr.f32.mxu0 %v204_v9 }
  0x9f   : > { %992 = vmatprep.mubr.f32.mxu1 %v204_v9  ;;  %1744 = vmatpush3.bf16.msra.mxu0 %v1743_v10 }
  0xa0   : > { %1746 = vmatprep.subr.bf16.mxu0 %v1745_v11  ;;  %1766 = vmatpush3.bf16.msra.mxu1 %v1743_v10 }
  0xa1   : > { %719 = vmatmul.mubr.f32.gmra.mrb[12].mxu0 %v203_v12  ;;  %1759 = vmatprep.subr.bf16.mxu1 %v1745_v11 }
  0xa2   : > { %993 = vmatmul.mubr.f32.gmra.mrb[12].mxu1 %v203_v12  ;;  %724 = vmatprep.mubr.f32.mxu0 %v208_v13 }
  0xa3   : > { %998 = vmatprep.mubr.f32.mxu1 %v208_v13  ;;  %1748 = vmatpush3.bf16.msra.mxu0 %v1747_v25 }
  0xa4   : > { %1767 = vmatpush3.bf16.msra.mxu1 %v1747_v25  ;;  %1750 = vmatprep.subr.bf16.mxu0 %v1749_v28 }
  0xa5   : > { %725 = vmatmul.mubr.f32.gmra.mrb[14].mxu0 %v207_v14  ;;  %1760 = vmatprep.subr.bf16.mxu1 %v1749_v28 }
  0xa6   : > { %999 = vmatmul.mubr.f32.gmra.mrb[14].mxu1 %v207_v14  ;;  %730 = vmatprep.mubr.f32.mxu0 %v212_v15 }
  0xa7   : > { %1004 = vmatprep.mubr.f32.mxu1 %v212_v15  ;;  %1752 = vmatpush3.bf16.msra.mxu0 %v1751_v31 }
  0xa8   : > { %1768 = vmatpush3.bf16.msra.mxu1 %v1751_v31 }
  0xa9   : > { %731 = vmatmul.mubr.f32.gmra.mrb[16].mxu0 %v211_v16 }
  0xaa   : > { %1005 = vmatmul.mubr.f32.gmra.mrb[16].mxu1 %v211_v16  ;;  %736 = vmatprep.mubr.f32.mxu0 %v216_v17 }
  0xab   : > { %1010 = vmatprep.mubr.f32.mxu1 %v216_v17 }
  0xad   : > { %737 = vmatmul.mubr.f32.gmra.mrb[18].mxu0 %v215_v18 }
  0xae   : > { %1011 = vmatmul.mubr.f32.gmra.mrb[18].mxu1 %v215_v18  ;;  %742 = vmatprep.mubr.f32.mxu0 %v220_v19 }
  0xaf   : > { %1016 = vmatprep.mubr.f32.mxu1 %v220_v19 }
  0xb1   : > { %743 = vmatmul.mubr.f32.gmra.mrb[20].mxu0 %v219_v20 }
  0xb2   : > { %1017 = vmatmul.mubr.f32.gmra.mrb[20].mxu1 %v219_v20  ;;  %748 = vmatprep.mubr.f32.mxu0 %v224_v21 }
  0xb3   : > { %1022 = vmatprep.mubr.f32.mxu1 %v224_v21 }
  0xb5   : > { %749 = vmatmul.mubr.f32.gmra.mrb[22].mxu0 %v223_v22 }
  0xb6   : > { %1023 = vmatmul.mubr.f32.gmra.mrb[22].mxu1 %v223_v22 }
 0x15c   : > { %v684_v32 = vpop.f32.mrb[0].mxu0 }
 0x15d   : > { %v1029_v33 = vmul.f32 %v684_v32, %v684_v32  ;;  %v958_v34 = vpop.f32.mrb[0].mxu1  ;;  %v686_v35 = vpop.f32.mrb[1].mxu0 }
 0x15e   : > { %v1053_v36 = vmul.f32 %v958_v34, %v958_v34  ;;  %v1030_v37 = vmul.f32 %v686_v35, %v686_v35  ;;  %v960_v38 = vpop.f32.mrb[1].mxu1 }
 0x15f   : > { %v1054_v39 = vmul.f32 %v960_v38, %v960_v38 }
 0x160   : > { %v1077_v40 = vadd.f32 %v1053_v36, %v1029_v33  ;;  %v690_v41 = vpop.f32.mrb[2].mxu0 }
 0x161   : > { %v1078_v42 = vadd.f32 %v1054_v39, %v1030_v37  ;;  %v1031_v43 = vmul.f32 %v690_v41, %v690_v41  ;;  %v964_v44 = vpop.f32.mrb[2].mxu1  ;;  %v692_v45 = vpop.f32.mrb[3].mxu0 }
 0x162   : > { %v1055_v46 = vmul.f32 %v964_v44, %v964_v44  ;;  %v1032_v47 = vmul.f32 %v692_v45, %v692_v45  ;;  %v966_v48 = vpop.f32.mrb[3].mxu1 }
 0x163   : > { %v1056_v49 = vmul.f32 %v966_v48, %v966_v48  ;;  %1197 = vmatprep.mubr.f32.mxu0 %v1078_v42 }
 0x164   : > { %v1079_v50 = vadd.f32 %v1055_v46, %v1031_v43  ;;  %1198 = vmatmul.mubr.f32.vlgmr.msra.gmra.mrb[24].mxu0 %v1077_v40  ;;  %v696_v51 = vpop.f32.mrb[4].mxu0 }
 0x165   : > { %v1080_v52 = vadd.f32 %v1056_v49, %v1032_v47  ;;  %v1033_v53 = vmul.f32 %v696_v51, %v696_v51  ;;  %v970_v54 = vpop.f32.mrb[4].mxu1  ;;  %v698_v55 = vpop.f32.mrb[5].mxu0 }
 0x166   : > { %v1057_v56 = vmul.f32 %v970_v54, %v970_v54  ;;  %v1034_v57 = vmul.f32 %v698_v55, %v698_v55  ;;  %v972_v58 = vpop.f32.mrb[5].mxu1 }
 0x167   : > { %v1058_v59 = vmul.f32 %v972_v58, %v972_v58  ;;  %1202 = vmatprep.mubr.f32.mxu0 %v1080_v52 }
 0x168   : > { %v1081_v60 = vadd.f32 %v1057_v56, %v1033_v53  ;;  %1203 = vmatmul.mubr.f32.gmra.mrb[26].mxu0 %v1079_v50  ;;  %v702_v61 = vpop.f32.mrb[6].mxu0 }
 0x169   : > { %v1082_v62 = vadd.f32 %v1058_v59, %v1034_v57  ;;  %v1035_v63 = vmul.f32 %v702_v61, %v702_v61  ;;  %v976_v0 = vpop.f32.mrb[6].mxu1  ;;  %v704_v1 = vpop.f32.mrb[7].mxu0 }
 0x16a   : > { %v1059_v2 = vmul.f32 %v976_v0, %v976_v0  ;;  %v1036_v3 = vmul.f32 %v704_v1, %v704_v1  ;;  %v978_v4 = vpop.f32.mrb[7].mxu1 }
 0x16b   : > { %v1060_v5 = vmul.f32 %v978_v4, %v978_v4  ;;  %1207 = vmatprep.mubr.f32.mxu0 %v1082_v62 }
 0x16c   : > { %v1083_v6 = vadd.f32 %v1059_v2, %v1035_v63  ;;  %1208 = vmatmul.mubr.f32.gmra.mrb[28].mxu0 %v1081_v60  ;;  %v708_v7 = vpop.f32.mrb[8].mxu0 }
 0x16d   : > { %v1084_v8 = vadd.f32 %v1060_v5, %v1036_v3  ;;  %v1037_v9 = vmul.f32 %v708_v7, %v708_v7  ;;  %v982_v10 = vpop.f32.mrb[8].mxu1  ;;  %v710_v11 = vpop.f32.mrb[9].mxu0 }
 0x16e   : > { %v1061_v12 = vmul.f32 %v982_v10, %v982_v10  ;;  %v1038_v13 = vmul.f32 %v710_v11, %v710_v11  ;;  %v984_v14 = vpop.f32.mrb[9].mxu1 }
 0x16f   : > { %v1062_v15 = vmul.f32 %v984_v14, %v984_v14  ;;  %1212 = vmatprep.mubr.f32.mxu0 %v1084_v8 }
 0x170   : > { %v1085_v16 = vadd.f32 %v1061_v12, %v1037_v9  ;;  %1213 = vmatmul.mubr.f32.gmra.mrb[30].mxu0 %v1083_v6  ;;  %v714_v17 = vpop.f32.mrb[10].mxu0 }
 0x171   : > { %v1086_v18 = vadd.f32 %v1062_v15, %v1038_v13  ;;  %v1039_v19 = vmul.f32 %v714_v17, %v714_v17  ;;  %v988_v20 = vpop.f32.mrb[10].mxu1  ;;  %v716_v21 = vpop.f32.mrb[11].mxu0 }
 0x172   : > { %v1063_v22 = vmul.f32 %v988_v20, %v988_v20  ;;  %v1040_v23 = vmul.f32 %v716_v21, %v716_v21  ;;  %v990_v24 = vpop.f32.mrb[11].mxu1 }
 0x173   : > { %v1064_v25 = vmul.f32 %v990_v24, %v990_v24  ;;  %1217 = vmatprep.mubr.f32.mxu0 %v1086_v18 }
 0x174   : > { %v1087_v26 = vadd.f32 %v1063_v22, %v1039_v19  ;;  %1218 = vmatmul.mubr.f32.gmra.mrb[32].mxu0 %v1085_v16  ;;  %v720_v27 = vpop.f32.mrb[12].mxu0 }
 0x175   : > { %v1088_v28 = vadd.f32 %v1064_v25, %v1040_v23  ;;  %v1041_v29 = vmul.f32 %v720_v27, %v720_v27  ;;  %v994_v30 = vpop.f32.mrb[12].mxu1  ;;  %v722_v31 = vpop.f32.mrb[13].mxu0 }
 0x176   : > { %v1065_v32 = vmul.f32 %v994_v30, %v994_v30  ;;  %v1042_v33 = vmul.f32 %v722_v31, %v722_v31  ;;  %v996_v34 = vpop.f32.mrb[13].mxu1 }
 0x177   : > { %v1066_v35 = vmul.f32 %v996_v34, %v996_v34  ;;  %1222 = vmatprep.mubr.f32.mxu0 %v1088_v28 }
 0x178   : > { %v1089_v36 = vadd.f32 %v1065_v32, %v1041_v29  ;;  %1223 = vmatmul.mubr.f32.gmra.mrb[34].mxu0 %v1087_v26  ;;  %v726_v37 = vpop.f32.mrb[14].mxu0 }
 0x179   : > { %v1090_v38 = vadd.f32 %v1066_v35, %v1042_v33  ;;  %v1043_v39 = vmul.f32 %v726_v37, %v726_v37  ;;  %v1000_v40 = vpop.f32.mrb[14].mxu1  ;;  %v728_v41 = vpop.f32.mrb[15].mxu0 }
 0x17a   : > { %v1067_v42 = vmul.f32 %v1000_v40, %v1000_v40  ;;  %v1044_v43 = vmul.f32 %v728_v41, %v728_v41  ;;  %v1002_v44 = vpop.f32.mrb[15].mxu1 }
 0x17b   : > { %v1068_v45 = vmul.f32 %v1002_v44, %v1002_v44  ;;  %1227 = vmatprep.mubr.f32.mxu1 %v1090_v38 }
 0x17c   : > { %v1091_v46 = vadd.f32 %v1067_v42, %v1043_v39  ;;  %1228 = vmatmul.mubr.f32.vlgmr.msra.gmra.mrb[24].mxu1 %v1089_v36  ;;  %v732_v47 = vpop.f32.mrb[16].mxu0 }
 0x17d   : > { %v1092_v48 = vadd.f32 %v1068_v45, %v1044_v43  ;;  %v1045_v49 = vmul.f32 %v732_v47, %v732_v47  ;;  %v1006_v50 = vpop.f32.mrb[16].mxu1  ;;  %v734_v51 = vpop.f32.mrb[17].mxu0 }
 0x17e   : > { %v1069_v52 = vmul.f32 %v1006_v50, %v1006_v50  ;;  %v1046_v53 = vmul.f32 %v734_v51, %v734_v51  ;;  %v1008_v54 = vpop.f32.mrb[17].mxu1 }
 0x17f   : > { %v1070_v55 = vmul.f32 %v1008_v54, %v1008_v54  ;;  %1232 = vmatprep.mubr.f32.mxu1 %v1092_v48 }
 0x180   : > { %v1093_v56 = vadd.f32 %v1069_v52, %v1045_v49  ;;  %1233 = vmatmul.mubr.f32.gmra.mrb[26].mxu1 %v1091_v46  ;;  %v738_v57 = vpop.f32.mrb[18].mxu0 }
 0x181   : > { %v1094_v58 = vadd.f32 %v1070_v55, %v1046_v53  ;;  %v1047_v59 = vmul.f32 %v738_v57, %v738_v57  ;;  %v1012_v60 = vpop.f32.mrb[18].mxu1  ;;  %v740_v61 = vpop.f32.mrb[19].mxu0 }
 0x182   : > { %v1071_v62 = vmul.f32 %v1012_v60, %v1012_v60  ;;  %v1048_v63 = vmul.f32 %v740_v61, %v740_v61  ;;  %v1014_v0 = vpop.f32.mrb[19].mxu1 }
 0x183   : > { %v1072_v1 = vmul.f32 %v1014_v0, %v1014_v0  ;;  %1237 = vmatprep.mubr.f32.mxu1 %v1094_v58 }
 0x184   : > { %v1095_v2 = vadd.f32 %v1071_v62, %v1047_v59  ;;  %1238 = vmatmul.mubr.f32.gmra.mrb[28].mxu1 %v1093_v56  ;;  %v744_v3 = vpop.f32.mrb[20].mxu0 }
 0x185   : > { %v1096_v4 = vadd.f32 %v1072_v1, %v1048_v63  ;;  %v1049_v5 = vmul.f32 %v744_v3, %v744_v3  ;;  %v1018_v6 = vpop.f32.mrb[20].mxu1  ;;  %v746_v7 = vpop.f32.mrb[21].mxu0 }
 0x186   : > { %v1073_v8 = vmul.f32 %v1018_v6, %v1018_v6  ;;  %v1050_v9 = vmul.f32 %v746_v7, %v746_v7  ;;  %v1020_v10 = vpop.f32.mrb[21].mxu1 }
 0x187   : > { %v1074_v11 = vmul.f32 %v1020_v10, %v1020_v10  ;;  %1242 = vmatprep.mubr.f32.mxu1 %v1096_v4 }
 0x188   : > { %v1097_v12 = vadd.f32 %v1073_v8, %v1049_v5  ;;  %1243 = vmatmul.mubr.f32.gmra.mrb[30].mxu1 %v1095_v2  ;;  %v750_v13 = vpop.f32.mrb[22].mxu0 }
 0x189   : > { %v1098_v14 = vadd.f32 %v1074_v11, %v1050_v9  ;;  %v1051_v15 = vmul.f32 %v750_v13, %v750_v13  ;;  %v1024_v16 = vpop.f32.mrb[22].mxu1  ;;  %v752_v17 = vpop.f32.mrb[23].mxu0 }
 0x18a   : > { %v1075_v18 = vmul.f32 %v1024_v16, %v1024_v16  ;;  %v1052_v19 = vmul.f32 %v752_v17, %v752_v17  ;;  %v1026_v20 = vpop.f32.mrb[23].mxu1 }
 0x18b   : > { %v1076_v21 = vmul.f32 %v1026_v20, %v1026_v20  ;;  %1247 = vmatprep.mubr.f32.mxu1 %v1098_v14 }
 0x18c   : > { %v1099_v22 = vadd.f32 %v1075_v18, %v1051_v15  ;;  %1248 = vmatmul.mubr.f32.gmra.mrb[32].mxu1 %v1097_v12 }
 0x18d   : > { %v1100_v23 = vadd.f32 %v1076_v21, %v1052_v19 }
 0x18f   : > { %1252 = vmatprep.mubr.f32.mxu1 %v1100_v23 }
 0x190   : > { %1253 = vmatmul.mubr.f32.gmra.mrb[34].mxu1 %v1099_v22 }
 0x237   : > { %v1429_v24 = vpop.f32.mrb[24].mxu0 }
 0x238   : > { %v1430_v25 = vpop.f32.mrb[25].mxu0 }
 0x239   : > { %v1431_v26 = vadd.f32 %v1430_v25, %v1429_v24 }
 0x23b   : > { %v1200_v27 = vadd.f32 1e-10, %v1431_v26  ;;  %v1432_v28 = vpop.f32.mrb[26].mxu0 }
 0x23c   : > { %v1433_v29 = vpop.f32.mrb[27].mxu0 }
 0x23d   : > { %1825 = vlog2.f32 %v1200_v27  ;;  %v1434_v30 = vadd.f32 %v1433_v29, %v1432_v28 }
 0x23f   : > { %v1205_v31 = vadd.f32 1e-10, %v1434_v30  ;;  %v1435_v32 = vpop.f32.mrb[28].mxu0 }
 0x240   : > { %v1436_v33 = vpop.f32.mrb[29].mxu0 }
 0x241   : > { %1827 = vlog2.f32 %v1205_v31  ;;  %v1437_v34 = vadd.f32 %v1436_v33, %v1435_v32 }
 0x243   : > { %v1210_v35 = vadd.f32 1e-10, %v1437_v34  ;;  %v1438_v36 = vpop.f32.mrb[30].mxu0 }
 0x244   : > { %v1439_v37 = vpop.f32.mrb[31].mxu0 }
 0x245   : > { %1829 = vlog2.f32 %v1210_v35  ;;  %v1440_v38 = vadd.f32 %v1439_v37, %v1438_v36 }
 0x247   : > { %v1826_v39 = vpop.eup %1825  ;;  %v1215_v40 = vadd.f32 1e-10, %v1440_v38  ;;  %v1441_v41 = vpop.f32.mrb[32].mxu0 }
 0x248   : > { %v1259_v42 = vmul.f32 0.6931472, %v1826_v39  ;;  %v1442_v43 = vpop.f32.mrb[33].mxu0 }
 0x249   : > { %1831 = vlog2.f32 %v1215_v40  ;;  %v1443_v44 = vadd.f32 %v1442_v43, %v1441_v41 }
 0x24a   : > { %v1382_v45 = vadd.f32 5.8703, %v1259_v42 }
 0x24b   : > { %v1828_v46 = vpop.eup %1827  ;;  %v1220_v47 = vadd.f32 1e-10, %v1443_v44  ;;  %v1444_v48 = vpop.f32.mrb[34].mxu0 }
 0x24c   : > { %v1294_v49 = vmul.f32 232.55814, %v1382_v45  ;;  %v1261_v50 = vmul.f32 0.6931472, %v1828_v46  ;;  %v1445_v51 = vpop.f32.mrb[35].mxu0 }
 0x24d   : > { %1833 = vlog2.f32 %v1220_v47  ;;  %v1446_v52 = vadd.f32 %v1445_v51, %v1444_v48 }
 0x24e   : > { %1306 = vst [vmem:[%s2817_s11] sm:$0xff] %v1294_v49  ;;  %v1383_v53 = vadd.f32 5.8703, %v1261_v50 }
 0x24f   : > { %v1830_v54 = vpop.eup %1829  ;;  %v1225_v55 = vadd.f32 1e-10, %v1446_v52  ;;  %v1447_v56 = vpop.f32.mrb[24].mxu1 }
 0x250   : > { %v1295_v57 = vmul.f32 232.55814, %v1383_v53  ;;  %v1263_v58 = vmul.f32 0.6931472, %v1830_v54  ;;  %v1448_v59 = vpop.f32.mrb[25].mxu1 }
 0x251   : > { %1835 = vlog2.f32 %v1225_v55  ;;  %v1449_v60 = vadd.f32 %v1448_v59, %v1447_v56 }
 0x252   : > { %1307 = vst [vmem:[%s2817_s11 + $0x8] sm:$0xff] %v1295_v57  ;;  %v1384_v61 = vadd.f32 5.8703, %v1263_v58 }
 0x253   : > { %v1832_v62 = vpop.eup %1831  ;;  %v1230_v63 = vadd.f32 1e-10, %v1449_v60  ;;  %v1450_v0 = vpop.f32.mrb[26].mxu1 }
 0x254   : > { %v1296_v1 = vmul.f32 232.55814, %v1384_v61  ;;  %v1265_v2 = vmul.f32 0.6931472, %v1832_v62  ;;  %v1451_v3 = vpop.f32.mrb[27].mxu1 }
 0x255   : > { %1837 = vlog2.f32 %v1230_v63  ;;  %v1452_v4 = vadd.f32 %v1451_v3, %v1450_v0 }
 0x256   : > { %1308 = vst [vmem:[%s2817_s11 + $0x10] sm:$0xff] %v1296_v1  ;;  %v1385_v5 = vadd.f32 5.8703, %v1265_v2 }
 0x257   : > { %v1834_v6 = vpop.eup %1833  ;;  %v1235_v7 = vadd.f32 1e-10, %v1452_v4  ;;  %v1453_v8 = vpop.f32.mrb[28].mxu1 }
 0x258   : > { %v1297_v9 = vmul.f32 232.55814, %v1385_v5  ;;  %v1267_v10 = vmul.f32 0.6931472, %v1834_v6  ;;  %v1454_v11 = vpop.f32.mrb[29].mxu1 }
 0x259   : > { %1839 = vlog2.f32 %v1235_v7  ;;  %v1455_v12 = vadd.f32 %v1454_v11, %v1453_v8 }
 0x25a   : > { %1309 = vst [vmem:[%s2817_s11 + $0x18] sm:$0xff] %v1297_v9  ;;  %v1386_v13 = vadd.f32 5.8703, %v1267_v10 }
 0x25b   : > { %v1836_v14 = vpop.eup %1835  ;;  %v1240_v15 = vadd.f32 1e-10, %v1455_v12  ;;  %v1456_v16 = vpop.f32.mrb[30].mxu1 }
 0x25c   : > { %v1298_v17 = vmul.f32 232.55814, %v1386_v13  ;;  %v1269_v18 = vmul.f32 0.6931472, %v1836_v14  ;;  %v1457_v19 = vpop.f32.mrb[31].mxu1 }
 0x25d   : > { %1841 = vlog2.f32 %v1240_v15  ;;  %v1458_v20 = vadd.f32 %v1457_v19, %v1456_v16 }
 0x25e   : > { %1310 = vst [vmem:[%s2817_s11 + $0x20] sm:$0xff] %v1298_v17  ;;  %v1387_v21 = vadd.f32 5.8703, %v1269_v18 }
 0x25f   : > { %v1838_v22 = vpop.eup %1837  ;;  %v1245_v23 = vadd.f32 1e-10, %v1458_v20  ;;  %v1459_v24 = vpop.f32.mrb[32].mxu1 }
 0x260   : > { %v1299_v25 = vmul.f32 232.55814, %v1387_v21  ;;  %v1271_v26 = vmul.f32 0.6931472, %v1838_v22  ;;  %v1460_v27 = vpop.f32.mrb[33].mxu1 }
 0x261   : > { %1843 = vlog2.f32 %v1245_v23  ;;  %v1461_v28 = vadd.f32 %v1460_v27, %v1459_v24 }
 0x262   : > { %1311 = vst [vmem:[%s2817_s11 + $0x28] sm:$0xff] %v1299_v25  ;;  %v1388_v29 = vadd.f32 5.8703, %v1271_v26 }
 0x263   : > { %v1840_v30 = vpop.eup %1839  ;;  %v1250_v31 = vadd.f32 1e-10, %v1461_v28  ;;  %v1462_v32 = vpop.f32.mrb[34].mxu1 }
 0x264   : > { %v1300_v33 = vmul.f32 232.55814, %v1388_v29  ;;  %v1273_v34 = vmul.f32 0.6931472, %v1840_v30  ;;  %v1463_v35 = vpop.f32.mrb[35].mxu1 }
 0x265   : > { %1845 = vlog2.f32 %v1250_v31  ;;  %v1464_v36 = vadd.f32 %v1463_v35, %v1462_v32 }
 0x266   : > { %1312 = vst [vmem:[%s2817_s11 + $0x30] sm:$0xff] %v1300_v33  ;;  %v1389_v37 = vadd.f32 5.8703, %v1273_v34 }
 0x267   : > { %v1842_v38 = vpop.eup %1841  ;;  %v1255_v39 = vadd.f32 1e-10, %v1464_v36 }
 0x268   : > { %v1301_v40 = vmul.f32 232.55814, %v1389_v37  ;;  %v1275_v41 = vmul.f32 0.6931472, %v1842_v38 }
 0x269   : > { %1847 = vlog2.f32 %v1255_v39 }
 0x26a   : > { %1313 = vst [vmem:[%s2817_s11 + $0x38] sm:$0xff] %v1301_v40  ;;  %v1390_v42 = vadd.f32 5.8703, %v1275_v41 }
 0x26b   : > { %v1844_v43 = vpop.eup %1843 }
 0x26c   : > { %v1302_v44 = vmul.f32 232.55814, %v1390_v42  ;;  %v1277_v45 = vmul.f32 0.6931472, %v1844_v43 }
 0x26e   : > { %1314 = vst [vmem:[%s2817_s11 + $0x40] sm:$0xff] %v1302_v44  ;;  %v1391_v46 = vadd.f32 5.8703, %v1277_v45 }
 0x26f   : > { %v1846_v47 = vpop.eup %1845 }
 0x270   : > { %v1303_v48 = vmul.f32 232.55814, %v1391_v46  ;;  %v1279_v49 = vmul.f32 0.6931472, %v1846_v47 }
 0x272   : > { %1315 = vst [vmem:[%s2817_s11 + $0x48] sm:$0xff] %v1303_v48  ;;  %v1392_v50 = vadd.f32 5.8703, %v1279_v49 }
 0x273   : > { %v1848_v51 = vpop.eup %1847 }
 0x274   : > { %v1304_v52 = vmul.f32 232.55814, %v1392_v50  ;;  %v1281_v53 = vmul.f32 0.6931472, %v1848_v51 }
 0x276   : > { %1316 = vst [vmem:[%s2817_s11 + $0x50] sm:$0xff] %v1304_v52  ;;  %v1393_v54 = vadd.f32 5.8703, %v1281_v53 }
 0x278   : > { %v1305_v55 = vmul.f32 232.55814, %v1393_v54 }
 0x27a   : > { %1317 = vst [vmem:[%s2817_s11 + $0x58] sm:$0xff] %v1305_v55 }
 0x27b PF: > { %s13_s12 = sadd.s32 1, %s1855_s12  }
 0x27c   : > { %p10_p4 = scmp.ge.s32.totalorder %s13_s12, 4  }
 0x27e   :  { %12 = sbr.rel (!%p10_p4) target bundleno = 1 (0x1), region = 62 }

</bundles_post_ra>
